<compile_context>
chip_gen: v7x
topology: tpu7x:2x2x1
jax: 0.10.0
libtpu: 0.0.40
codegen_flags: <defaults>
</compile_context>

<pallas_src>
import functools

import jax
import jax.numpy as jnp
from jax.experimental import pallas as pl
from jax.experimental.pallas import tpu as pltpu


# ----------------------------- configuration --------------------------------
N_BATCH = 2
N_LEN = 8
N_VOCAB = 32
D_EMB = 16
D_H = 32          # encoder GRU hidden (q.d_h)
D_Z = 8
D_C = 4
D_DEC_H = D_Z + D_C
N_FILTERS = 8     # d.n_filters for disc CNN
CONV_K = 3        # disc CNN kernel width
P_WORD_DROPOUT = 0.3
UNK, PAD, BOS, EOS = 0, 1, 2, 3
ATTENTION = False

VMEM_SPEC = pl.BlockSpec(memory_space=pltpu.MemorySpace.VMEM)
SMEM_SPEC = pl.BlockSpec(memory_space=pltpu.MemorySpace.SMEM)


# ------------------------------- fused kernel --------------------------------
def fused_vae_kernel(*refs, use_c_prior):
    """Whole RnnVae forward in one kernel; emits only the two scalar losses.

    Time-major row layout everywhere: row index = t * B + b.
    GRU weights packed gate-wise along the output dim, PyTorch order (r, z, n):
      W_ih (d_in, 3*d_h), W_hh (d_h, 3*d_h).
    Input bias already includes b_hh of the r/z gates (folded host-side);
    the remaining b_hn of the n gate is passed separately.
    """
    (enc_x_ref, dec_x_ref, eps_ref, tgt_ref,
     enc_wih_ref, enc_whh_ref, enc_bi_ref, enc_bhn_ref,
     qmu_w_ref, qmu_b_ref, qlv_w_ref, qlv_b_ref,
     dec_wih_emb_ref, dec_wih_zc_ref, dec_whh_ref,
     dec_bi_ref, dec_bhn_ref, dec_fc_w_ref, dec_fc_b_ref) = refs[:19]
    if use_c_prior:
        c_ref = refs[19]
        kl_ref, recon_ref = refs[20:]
    else:
        (patches_ref, dconv_w_ref, dconv_b_ref,
         dfc_w_ref, dfc_b_ref) = refs[19:24]
        kl_ref, recon_ref = refs[24:]

    f32 = jnp.float32
    bf16 = jnp.bfloat16
    B = eps_ref.shape[0]
    d_h = enc_bhn_ref.shape[1]
    d_dh = dec_bhn_ref.shape[1]
    L = enc_x_ref.shape[0] // B
    n_rows = dec_x_ref.shape[0]            # (L-1)*B
    Lm1 = n_rows // B

    def bdot(a, b):
        # bf16 MXU operands (native on v5e/v6e/v7x); f32 accumulate.
        return jnp.dot(a.astype(bf16), b.astype(bf16),
                       preferred_element_type=f32)

    # ------------- encoder GRU (fused-gate, input projection hoisted) -------
    e_gi = bdot(enc_x_ref[...], enc_wih_ref[...]) + enc_bi_ref[...]  # (L*B, 3*d_h)
    e_whh = enc_whh_ref[...].astype(bf16)                            # cast once
    e_bhn = enc_bhn_ref[...]                                         # (1, d_h)

    h = jnp.zeros((B, d_h), f32)
    for t in range(L):                     # static unroll: L small & fixed
        gi = e_gi[t * B:(t + 1) * B]
        gh = jnp.dot(h.astype(bf16), e_whh, preferred_element_type=f32)
        r = jax.nn.sigmoid(gi[:, 0:d_h] + gh[:, 0:d_h])
        u = jax.nn.sigmoid(gi[:, d_h:2 * d_h] + gh[:, d_h:2 * d_h])
        n = jnp.tanh(gi[:, 2 * d_h:] + r * (gh[:, 2 * d_h:] + e_bhn))
        h = (1.0 - u) * n + u * h          # only h_last kept, in vregs

    # ---------------- q_mu / q_logvar, reparam, KL ----------------
    mu = bdot(h, qmu_w_ref[...]) + qmu_b_ref[...]
    logvar = bdot(h, qlv_w_ref[...]) + qlv_b_ref[...]
    z = mu + jnp.exp(0.5 * logvar) * eps_ref[...]
    kl = 0.5 * (jnp.exp(logvar) + mu * mu - 1.0 - logvar)
    kl_ref[0, 0] = jnp.sum(kl) * (1.0 / B)     # sum over d_z, mean over batch

    # ---------------- code c ----------------
    if use_c_prior:
        c = c_ref[...]
    else:
        # Conv1d-as-single-2D-matmul + ReLU + max-over-time + linear + softmax.
        pf = patches_ref[...]                  # (l_out*B, K*E), time-major rows
        l_out = pf.shape[0] // B
        conv = jnp.maximum(bdot(pf, dconv_w_ref[...]) + dconv_b_ref[...], 0.0)
        pooled = conv[0:B]                     # max over time via row-slab maxima
        for l in range(1, l_out):
            pooled = jnp.maximum(pooled, conv[l * B:(l + 1) * B])
        c_logits = bdot(pooled, dfc_w_ref[...]) + dfc_b_ref[...]
        m_c = jnp.max(c_logits, axis=1, keepdims=True)
        e_c = jnp.exp(c_logits - m_c)
        c = e_c / jnp.sum(e_c, axis=1, keepdims=True)        # (B, d_c)

    # ---------------- decoder GRU (last timestep skipped: dead work) --------
    zc = jnp.concatenate([z, c], axis=1)                      # (B, d_z+d_c)
    d_gi = bdot(dec_x_ref[...], dec_wih_emb_ref[...])         # (n_rows, 3*d_dh)
    # time-invariant z||c contribution + folded biases (one per gate triple)
    d_gz = bdot(zc, dec_wih_zc_ref[...]) + dec_bi_ref[...]    # (B, 3*d_dh)
    d_whh = dec_whh_ref[...].astype(bf16)
    d_bhn = dec_bhn_ref[...]

    h = zc                                                    # h_init
    hs = []
    for t in range(Lm1):                                      # static unroll
        gi = d_gi[t * B:(t + 1) * B] + d_gz
        gh = jnp.dot(h.astype(bf16), d_whh, preferred_element_type=f32)
        r = jax.nn.sigmoid(gi[:, 0:d_dh] + gh[:, 0:d_dh])
        u = jax.nn.sigmoid(gi[:, d_dh:2 * d_dh] + gh[:, d_dh:2 * d_dh])
        n = jnp.tanh(gi[:, 2 * d_dh:] + r * (gh[:, 2 * d_dh:] + d_bhn))
        h = (1.0 - u) * n + u * h
        hs.append(h)                                          # stays in vregs

    hs_all = jnp.concatenate(hs, axis=0)                      # (n_rows, d_dh)

    # ---------------- decoder head + cross-entropy (fused) ----------------
    # (attention branch skipped: ATTENTION=False)
    logits = bdot(hs_all, dec_fc_w_ref[...]) + dec_fc_b_ref[...]   # (n_rows, V)
    m = jnp.max(logits, axis=1, keepdims=True)
    lse = m + jnp.log(jnp.sum(jnp.exp(logits - m), axis=1, keepdims=True))
    col = jax.lax.broadcasted_iota(jnp.int32, logits.shape, 1)
    picked = jnp.sum(jnp.where(col == tgt_ref[...], logits, 0.0),
                     axis=1, keepdims=True)
    recon_ref[0, 0] = jnp.sum(lse - picked) * (1.0 / n_rows)


# ----------------------------- parameter init --------------------------------
def init_params(key):
    def nrm(k, shape, scale=0.1):
        return (scale * jax.random.normal(k, shape)).astype(jnp.float32)

    ks = jax.random.split(key, 21)
    p = {
        # embedding (padding_idx -> zero row, matching nn.Embedding)
        'x_emb': nrm(ks[0], (N_VOCAB, D_EMB)).at[PAD].set(0.0),
        # encoder GRU, gates packed along output dim (PyTorch order r, z, n)
        'enc_wih': nrm(ks[1], (D_EMB, 3 * D_H)),
        'enc_whh': nrm(ks[2], (D_H, 3 * D_H)),
        'enc_bih': nrm(ks[3], (1, 3 * D_H)),
        'enc_bhh': nrm(ks[4], (1, 3 * D_H)),
        'q_mu_w': nrm(ks[5], (D_H, D_Z)),
        'q_mu_b': nrm(ks[6], (1, D_Z)),
        'q_lv_w': nrm(ks[7], (D_H, D_Z)),
        'q_lv_b': nrm(ks[8], (1, D_Z)),
        # decoder GRU (input = emb || z || c); W_ih split into emb / z||c parts
        'dec_wih_emb': nrm(ks[9], (D_EMB, 3 * D_DEC_H)),
        'dec_wih_zc': nrm(ks[10], (D_Z + D_C, 3 * D_DEC_H)),
        'dec_whh': nrm(ks[11], (D_DEC_H, 3 * D_DEC_H)),
        'dec_bih': nrm(ks[12], (1, 3 * D_DEC_H)),
        'dec_bhh': nrm(ks[13], (1, 3 * D_DEC_H)),
        'dec_fc_w': nrm(ks[14], (D_DEC_H, N_VOCAB)),
        'dec_fc_b': nrm(ks[15], (1, N_VOCAB)),
        # discriminator CNN (assumed architecture, see TODO at top)
        'disc_emb': nrm(ks[16], (N_VOCAB, D_EMB)),
        'disc_conv_w': nrm(ks[17], (CONV_K * D_EMB, N_FILTERS)),
        'disc_conv_b': nrm(ks[18], (1, N_FILTERS)),
        'disc_fc_w': nrm(ks[19], (N_FILTERS, D_C)),
        'disc_fc_b': nrm(ks[20], (1, D_C)),
    }
    return p


# ------------------------------ forward pass ---------------------------------
@functools.partial(jax.jit, static_argnames=('use_c_prior',))
def rnn_vae_forward(params, x, rng, use_c_prior=False):
    """x: (n_batch, n_len) int32.  Returns (kl_loss, recon_loss) scalars."""
    B, L = x.shape
    k_drop, k_eps, k_wdrop, k_cprior = jax.random.split(rng, 4)

    # ---- encoder input: embedding + F.dropout(p=0.5, training=True) ----
    x_emb = jnp.take(params['x_emb'], x, axis=0)                   # (B, L, E)
    keep = jax.random.bernoulli(k_drop, 0.5, x_emb.shape)
    x_emb = jnp.where(keep, x_emb * 2.0, 0.0)
    enc_x = jnp.transpose(x_emb, (1, 0, 2)).reshape(L * B, D_EMB)  # t-major

    # ---- decoder input: word dropout + embedding (only t < L-1 is used) ----
    drop_mask = jax.random.bernoulli(k_wdrop, P_WORD_DROPOUT, x.shape)
    x_drop = jnp.where(drop_mask, jnp.int32(UNK), x)
    dec_x = jnp.take(params['x_emb'], x_drop.T[:L - 1],
                     axis=0).reshape((L - 1) * B, D_EMB)           # t-major

    # ---- reparameterization noise & int32 CE targets (t-major column) ----
    eps = jax.random.normal(k_eps, (B, D_Z), jnp.float32)
    tgt = x[:, 1:].T.reshape((L - 1) * B, 1).astype(jnp.int32)

    # ---- fold b_hh of r/z gates into the hoisted input-projection bias ----
    def fold(bih, bhh, d):
        rz = jnp.concatenate([bhh[:, :2 * d], jnp.zeros((1, d), jnp.float32)],
                             axis=1)
        return bih + rz

    enc_bi = fold(params['enc_bih'], params['enc_bhh'], D_H)
    enc_bhn = params['enc_bhh'][:, 2 * D_H:]
    dec_bi = fold(params['dec_bih'], params['dec_bhh'], D_DEC_H)
    dec_bhn = params['dec_bhh'][:, 2 * D_DEC_H:]

    common = [enc_x, dec_x, eps, tgt,
              params['enc_wih'], params['enc_whh'], enc_bi, enc_bhn,
              params['q_mu_w'], params['q_mu_b'],
              params['q_lv_w'], params['q_lv_b'],
              params['dec_wih_emb'], params['dec_wih_zc'], params['dec_whh'],
              dec_bi, dec_bhn,
              params['dec_fc_w'], params['dec_fc_b']]

    if use_c_prior:
        inds = jax.random.randint(k_cprior, (B,), 0, D_C)
        c = jax.nn.one_hot(inds, D_C, dtype=jnp.float32)
        extra = [c]
    else:
        d_emb = jnp.take(params['disc_emb'], x, axis=0)            # (B, L, E)
        l_out = L - CONV_K + 1
        patches = jnp.concatenate(
            [d_emb[:, j:j + l_out, :] for j in range(CONV_K)], axis=-1)
        # time-major flat patches: row = l*B + b, cols = K*E
        patches = jnp.transpose(patches, (1, 0, 2)).reshape(
            l_out * B, CONV_K * D_EMB)
        extra = [patches, params['disc_conv_w'], params['disc_conv_b'],
                 params['disc_fc_w'], params['disc_fc_b']]

    kernel = functools.partial(fused_vae_kernel, use_c_prior=use_c_prior)
    kl, recon = pl.pallas_call(
        kernel,
        out_shape=(jax.ShapeDtypeStruct((1, 1), jnp.float32),
                   jax.ShapeDtypeStruct((1, 1), jnp.float32)),
        in_specs=[VMEM_SPEC] * (len(common) + len(extra)),
        out_specs=(SMEM_SPEC, SMEM_SPEC),
    )(*common, *extra)
    return kl[0, 0], recon[0, 0]


# ---------------------------------- main --------------------------------------
if __name__ == "__main__":
    key = jax.random.PRNGKey(0)
    k_param, k_data, k_fwd = jax.random.split(key, 3)
    params = init_params(k_param)

    x = jax.random.randint(k_data, (N_BATCH, N_LEN), 0, N_VOCAB, dtype=jnp.int32)
    x = x.at[:, 0].set(BOS).at[:, -1].set(EOS)

    kl_loss, recon_loss = rnn_vae_forward(params, x, k_fwd, use_c_prior=False)
    jax.block_until_ready((kl_loss, recon_loss))
    assert kl_loss.shape == () and recon_loss.shape == ()
    assert jnp.isfinite(kl_loss) and jnp.isfinite(recon_loss)
    print("KERNEL_OK")
</pallas_src>

<mosaic_0001>
module attributes {stable_mosaic.version = 11 : i64} {
  func.func @fused_vae_kernel(%arg0: memref<16x16xf32, #tpu.memory_space<vmem>>, %arg1: memref<14x16xf32, #tpu.memory_space<vmem>>, %arg2: memref<2x8xf32, #tpu.memory_space<vmem>>, %arg3: memref<14x1xi32, #tpu.memory_space<vmem>>, %arg4: memref<16x96xf32, #tpu.memory_space<vmem>>, %arg5: memref<32x96xf32, #tpu.memory_space<vmem>>, %arg6: memref<1x96xf32, #tpu.memory_space<vmem>>, %arg7: memref<1x32xf32, #tpu.memory_space<vmem>>, %arg8: memref<32x8xf32, #tpu.memory_space<vmem>>, %arg9: memref<1x8xf32, #tpu.memory_space<vmem>>, %arg10: memref<32x8xf32, #tpu.memory_space<vmem>>, %arg11: memref<1x8xf32, #tpu.memory_space<vmem>>, %arg12: memref<16x36xf32, #tpu.memory_space<vmem>>, %arg13: memref<12x36xf32, #tpu.memory_space<vmem>>, %arg14: memref<12x36xf32, #tpu.memory_space<vmem>>, %arg15: memref<1x36xf32, #tpu.memory_space<vmem>>, %arg16: memref<1x12xf32, #tpu.memory_space<vmem>>, %arg17: memref<12x32xf32, #tpu.memory_space<vmem>>, %arg18: memref<1x32xf32, #tpu.memory_space<vmem>>, %arg19: memref<12x48xf32, #tpu.memory_space<vmem>>, %arg20: memref<48x8xf32, #tpu.memory_space<vmem>>, %arg21: memref<1x8xf32, #tpu.memory_space<vmem>>, %arg22: memref<8x4xf32, #tpu.memory_space<vmem>>, %arg23: memref<1x4xf32, #tpu.memory_space<vmem>>, %arg24: memref<1x1xf32, #tpu.memory_space<smem>>, %arg25: memref<1x1xf32, #tpu.memory_space<smem>>) attributes {dimension_semantics = [], scalar_prefetch = 0 : i64, scratch_operands = 0 : i64, tpu.core_type = #tpu.core_type<tc>} {
    %c0 = arith.constant 0 : index
    %c0_0 = arith.constant 0 : index
    %0 = vector.load %arg0[%c0, %c0_0] : memref<16x16xf32, #tpu.memory_space<vmem>>, vector<16x16xf32>
    %c0_1 = arith.constant 0 : index
    %c0_2 = arith.constant 0 : index
    %1 = vector.load %arg4[%c0_1, %c0_2] : memref<16x96xf32, #tpu.memory_space<vmem>>, vector<16x96xf32>
    %2 = arith.truncf %0 : vector<16x16xf32> to vector<16x16xbf16>
    %3 = arith.truncf %1 : vector<16x96xf32> to vector<16x96xbf16>
    %cst = arith.constant dense<0.000000e+00> : vector<16x96xf32>
    %4 = tpu.matmul %2, %3, %cst {dimension_numbers = #tpu.dot_dimension_numbers<[1], [0], [0], [1], [0, 0, 1, 1], [], []>} : vector<16x16xbf16>, vector<16x96xbf16>, vector<16x96xf32> -> vector<16x96xf32>
    %c0_3 = arith.constant 0 : index
    %c0_4 = arith.constant 0 : index
    %5 = vector.load %arg6[%c0_3, %c0_4] : memref<1x96xf32, #tpu.memory_space<vmem>>, vector<1x96xf32>
    %6 = vector.broadcast %5 : vector<1x96xf32> to vector<16x96xf32>
    %7 = arith.addf %4, %6 : vector<16x96xf32>
    %c0_5 = arith.constant 0 : index
    %c0_6 = arith.constant 0 : index
    %8 = vector.load %arg5[%c0_5, %c0_6] : memref<32x96xf32, #tpu.memory_space<vmem>>, vector<32x96xf32>
    %9 = arith.truncf %8 : vector<32x96xf32> to vector<32x96xbf16>
    %c0_7 = arith.constant 0 : index
    %c0_8 = arith.constant 0 : index
    %10 = vector.load %arg7[%c0_7, %c0_8] : memref<1x32xf32, #tpu.memory_space<vmem>>, vector<1x32xf32>
    %cst_9 = arith.constant 0.000000e+00 : f32
    %11 = vector.broadcast %cst_9 : f32 to vector<2x32xf32>
    %12 = vector.extract_strided_slice %7 {offsets = [0, 0], sizes = [2, 96], strides = [1, 1]} : vector<16x96xf32> to vector<2x96xf32>
    %13 = arith.truncf %11 : vector<2x32xf32> to vector<2x32xbf16>
    %cst_10 = arith.constant dense<0.000000e+00> : vector<2x96xf32>
    %14 = tpu.matmul %13, %9, %cst_10 {dimension_numbers = #tpu.dot_dimension_numbers<[1], [0], [0], [1], [0, 0, 1, 1], [], []>} : vector<2x32xbf16>, vector<32x96xbf16>, vector<2x96xf32> -> vector<2x96xf32>
    %15 = vector.extract_strided_slice %12 {offsets = [0, 0], sizes = [2, 32], strides = [1, 1]} : vector<2x96xf32> to vector<2x32xf32>
    %16 = vector.extract_strided_slice %14 {offsets = [0, 0], sizes = [2, 32], strides = [1, 1]} : vector<2x96xf32> to vector<2x32xf32>
    %17 = arith.addf %15, %16 : vector<2x32xf32>
    %18 = arith.negf %17 : vector<2x32xf32>
    %19 = math.exp %18 : vector<2x32xf32>
    %cst_11 = arith.constant 1.000000e+00 : f32
    %20 = vector.broadcast %cst_11 : f32 to vector<2x32xf32>
    %21 = arith.addf %20, %19 : vector<2x32xf32>
    %22 = arith.divf %20, %21 : vector<2x32xf32>
    %23 = vector.extract_strided_slice %12 {offsets = [0, 32], sizes = [2, 32], strides = [1, 1]} : vector<2x96xf32> to vector<2x32xf32>
    %24 = vector.extract_strided_slice %14 {offsets = [0, 32], sizes = [2, 32], strides = [1, 1]} : vector<2x96xf32> to vector<2x32xf32>
    %25 = arith.addf %23, %24 : vector<2x32xf32>
    %26 = arith.negf %25 : vector<2x32xf32>
    %27 = math.exp %26 : vector<2x32xf32>
    %cst_12 = arith.constant 1.000000e+00 : f32
    %28 = vector.broadcast %cst_12 : f32 to vector<2x32xf32>
    %29 = arith.addf %28, %27 : vector<2x32xf32>
    %30 = arith.divf %28, %29 : vector<2x32xf32>
    %31 = vector.extract_strided_slice %12 {offsets = [0, 64], sizes = [2, 32], strides = [1, 1]} : vector<2x96xf32> to vector<2x32xf32>
    %32 = vector.extract_strided_slice %14 {offsets = [0, 64], sizes = [2, 32], strides = [1, 1]} : vector<2x96xf32> to vector<2x32xf32>
    %33 = vector.broadcast %10 : vector<1x32xf32> to vector<2x32xf32>
    %34 = arith.addf %32, %33 : vector<2x32xf32>
    %35 = arith.mulf %22, %34 : vector<2x32xf32>
    %36 = arith.addf %31, %35 : vector<2x32xf32>
    %37 = math.tanh %36 : vector<2x32xf32>
    %cst_13 = arith.constant 1.000000e+00 : f32
    %38 = vector.broadcast %cst_13 : f32 to vector<2x32xf32>
    %39 = arith.subf %38, %30 : vector<2x32xf32>
    %40 = arith.mulf %39, %37 : vector<2x32xf32>
    %41 = arith.mulf %30, %11 : vector<2x32xf32>
    %42 = arith.addf %40, %41 : vector<2x32xf32>
    %43 = vector.extract_strided_slice %7 {offsets = [2, 0], sizes = [2, 96], strides = [1, 1]} : vector<16x96xf32> to vector<2x96xf32>
    %44 = arith.truncf %42 : vector<2x32xf32> to vector<2x32xbf16>
    %cst_14 = arith.constant dense<0.000000e+00> : vector<2x96xf32>
    %45 = tpu.matmul %44, %9, %cst_14 {dimension_numbers = #tpu.dot_dimension_numbers<[1], [0], [0], [1], [0, 0, 1, 1], [], []>} : vector<2x32xbf16>, vector<32x96xbf16>, vector<2x96xf32> -> vector<2x96xf32>
    %46 = vector.extract_strided_slice %43 {offsets = [0, 0], sizes = [2, 32], strides = [1, 1]} : vector<2x96xf32> to vector<2x32xf32>
    %47 = vector.extract_strided_slice %45 {offsets = [0, 0], sizes = [2, 32], strides = [1, 1]} : vector<2x96xf32> to vector<2x32xf32>
    %48 = arith.addf %46, %47 : vector<2x32xf32>
    %49 = arith.negf %48 : vector<2x32xf32>
    %50 = math.exp %49 : vector<2x32xf32>
    %cst_15 = arith.constant 1.000000e+00 : f32
    %51 = vector.broadcast %cst_15 : f32 to vector<2x32xf32>
    %52 = arith.addf %51, %50 : vector<2x32xf32>
    %53 = arith.divf %51, %52 : vector<2x32xf32>
    %54 = vector.extract_strided_slice %43 {offsets = [0, 32], sizes = [2, 32], strides = [1, 1]} : vector<2x96xf32> to vector<2x32xf32>
    %55 = vector.extract_strided_slice %45 {offsets = [0, 32], sizes = [2, 32], strides = [1, 1]} : vector<2x96xf32> to vector<2x32xf32>
    %56 = arith.addf %54, %55 : vector<2x32xf32>
    %57 = arith.negf %56 : vector<2x32xf32>
    %58 = math.exp %57 : vector<2x32xf32>
    %cst_16 = arith.constant 1.000000e+00 : f32
    %59 = vector.broadcast %cst_16 : f32 to vector<2x32xf32>
    %60 = arith.addf %59, %58 : vector<2x32xf32>
    %61 = arith.divf %59, %60 : vector<2x32xf32>
    %62 = vector.extract_strided_slice %43 {offsets = [0, 64], sizes = [2, 32], strides = [1, 1]} : vector<2x96xf32> to vector<2x32xf32>
    %63 = vector.extract_strided_slice %45 {offsets = [0, 64], sizes = [2, 32], strides = [1, 1]} : vector<2x96xf32> to vector<2x32xf32>
    %64 = vector.broadcast %10 : vector<1x32xf32> to vector<2x32xf32>
    %65 = arith.addf %63, %64 : vector<2x32xf32>
    %66 = arith.mulf %53, %65 : vector<2x32xf32>
    %67 = arith.addf %62, %66 : vector<2x32xf32>
    %68 = math.tanh %67 : vector<2x32xf32>
    %cst_17 = arith.constant 1.000000e+00 : f32
    %69 = vector.broadcast %cst_17 : f32 to vector<2x32xf32>
    %70 = arith.subf %69, %61 : vector<2x32xf32>
    %71 = arith.mulf %70, %68 : vector<2x32xf32>
    %72 = arith.mulf %61, %42 : vector<2x32xf32>
    %73 = arith.addf %71, %72 : vector<2x32xf32>
    %74 = vector.extract_strided_slice %7 {offsets = [4, 0], sizes = [2, 96], strides = [1, 1]} : vector<16x96xf32> to vector<2x96xf32>
    %75 = arith.truncf %73 : vector<2x32xf32> to vector<2x32xbf16>
    %cst_18 = arith.constant dense<0.000000e+00> : vector<2x96xf32>
    %76 = tpu.matmul %75, %9, %cst_18 {dimension_numbers = #tpu.dot_dimension_numbers<[1], [0], [0], [1], [0, 0, 1, 1], [], []>} : vector<2x32xbf16>, vector<32x96xbf16>, vector<2x96xf32> -> vector<2x96xf32>
    %77 = vector.extract_strided_slice %74 {offsets = [0, 0], sizes = [2, 32], strides = [1, 1]} : vector<2x96xf32> to vector<2x32xf32>
    %78 = vector.extract_strided_slice %76 {offsets = [0, 0], sizes = [2, 32], strides = [1, 1]} : vector<2x96xf32> to vector<2x32xf32>
    %79 = arith.addf %77, %78 : vector<2x32xf32>
    %80 = arith.negf %79 : vector<2x32xf32>
    %81 = math.exp %80 : vector<2x32xf32>
    %cst_19 = arith.constant 1.000000e+00 : f32
    %82 = vector.broadcast %cst_19 : f32 to vector<2x32xf32>
    %83 = arith.addf %82, %81 : vector<2x32xf32>
    %84 = arith.divf %82, %83 : vector<2x32xf32>
    %85 = vector.extract_strided_slice %74 {offsets = [0, 32], sizes = [2, 32], strides = [1, 1]} : vector<2x96xf32> to vector<2x32xf32>
    %86 = vector.extract_strided_slice %76 {offsets = [0, 32], sizes = [2, 32], strides = [1, 1]} : vector<2x96xf32> to vector<2x32xf32>
    %87 = arith.addf %85, %86 : vector<2x32xf32>
    %88 = arith.negf %87 : vector<2x32xf32>
    %89 = math.exp %88 : vector<2x32xf32>
    %cst_20 = arith.constant 1.000000e+00 : f32
    %90 = vector.broadcast %cst_20 : f32 to vector<2x32xf32>
    %91 = arith.addf %90, %89 : vector<2x32xf32>
    %92 = arith.divf %90, %91 : vector<2x32xf32>
    %93 = vector.extract_strided_slice %74 {offsets = [0, 64], sizes = [2, 32], strides = [1, 1]} : vector<2x96xf32> to vector<2x32xf32>
    %94 = vector.extract_strided_slice %76 {offsets = [0, 64], sizes = [2, 32], strides = [1, 1]} : vector<2x96xf32> to vector<2x32xf32>
    %95 = vector.broadcast %10 : vector<1x32xf32> to vector<2x32xf32>
    %96 = arith.addf %94, %95 : vector<2x32xf32>
    %97 = arith.mulf %84, %96 : vector<2x32xf32>
    %98 = arith.addf %93, %97 : vector<2x32xf32>
    %99 = math.tanh %98 : vector<2x32xf32>
    %cst_21 = arith.constant 1.000000e+00 : f32
    %100 = vector.broadcast %cst_21 : f32 to vector<2x32xf32>
    %101 = arith.subf %100, %92 : vector<2x32xf32>
    %102 = arith.mulf %101, %99 : vector<2x32xf32>
    %103 = arith.mulf %92, %73 : vector<2x32xf32>
    %104 = arith.addf %102, %103 : vector<2x32xf32>
    %105 = vector.extract_strided_slice %7 {offsets = [6, 0], sizes = [2, 96], strides = [1, 1]} : vector<16x96xf32> to vector<2x96xf32>
    %106 = arith.truncf %104 : vector<2x32xf32> to vector<2x32xbf16>
    %cst_22 = arith.constant dense<0.000000e+00> : vector<2x96xf32>
    %107 = tpu.matmul %106, %9, %cst_22 {dimension_numbers = #tpu.dot_dimension_numbers<[1], [0], [0], [1], [0, 0, 1, 1], [], []>} : vector<2x32xbf16>, vector<32x96xbf16>, vector<2x96xf32> -> vector<2x96xf32>
    %108 = vector.extract_strided_slice %105 {offsets = [0, 0], sizes = [2, 32], strides = [1, 1]} : vector<2x96xf32> to vector<2x32xf32>
    %109 = vector.extract_strided_slice %107 {offsets = [0, 0], sizes = [2, 32], strides = [1, 1]} : vector<2x96xf32> to vector<2x32xf32>
    %110 = arith.addf %108, %109 : vector<2x32xf32>
    %111 = arith.negf %110 : vector<2x32xf32>
    %112 = math.exp %111 : vector<2x32xf32>
    %cst_23 = arith.constant 1.000000e+00 : f32
    %113 = vector.broadcast %cst_23 : f32 to vector<2x32xf32>
    %114 = arith.addf %113, %112 : vector<2x32xf32>
    %115 = arith.divf %113, %114 : vector<2x32xf32>
    %116 = vector.extract_strided_slice %105 {offsets = [0, 32], sizes = [2, 32], strides = [1, 1]} : vector<2x96xf32> to vector<2x32xf32>
    %117 = vector.extract_strided_slice %107 {offsets = [0, 32], sizes = [2, 32], strides = [1, 1]} : vector<2x96xf32> to vector<2x32xf32>
    %118 = arith.addf %116, %117 : vector<2x32xf32>
    %119 = arith.negf %118 : vector<2x32xf32>
    %120 = math.exp %119 : vector<2x32xf32>
    %cst_24 = arith.constant 1.000000e+00 : f32
    %121 = vector.broadcast %cst_24 : f32 to vector<2x32xf32>
    %122 = arith.addf %121, %120 : vector<2x32xf32>
    %123 = arith.divf %121, %122 : vector<2x32xf32>
    %124 = vector.extract_strided_slice %105 {offsets = [0, 64], sizes = [2, 32], strides = [1, 1]} : vector<2x96xf32> to vector<2x32xf32>
    %125 = vector.extract_strided_slice %107 {offsets = [0, 64], sizes = [2, 32], strides = [1, 1]} : vector<2x96xf32> to vector<2x32xf32>
    %126 = vector.broadcast %10 : vector<1x32xf32> to vector<2x32xf32>
    %127 = arith.addf %125, %126 : vector<2x32xf32>
    %128 = arith.mulf %115, %127 : vector<2x32xf32>
    %129 = arith.addf %124, %128 : vector<2x32xf32>
    %130 = math.tanh %129 : vector<2x32xf32>
    %cst_25 = arith.constant 1.000000e+00 : f32
    %131 = vector.broadcast %cst_25 : f32 to vector<2x32xf32>
    %132 = arith.subf %131, %123 : vector<2x32xf32>
    %133 = arith.mulf %132, %130 : vector<2x32xf32>
    %134 = arith.mulf %123, %104 : vector<2x32xf32>
    %135 = arith.addf %133, %134 : vector<2x32xf32>
    %136 = vector.extract_strided_slice %7 {offsets = [8, 0], sizes = [2, 96], strides = [1, 1]} : vector<16x96xf32> to vector<2x96xf32>
    %137 = arith.truncf %135 : vector<2x32xf32> to vector<2x32xbf16>
    %cst_26 = arith.constant dense<0.000000e+00> : vector<2x96xf32>
    %138 = tpu.matmul %137, %9, %cst_26 {dimension_numbers = #tpu.dot_dimension_numbers<[1], [0], [0], [1], [0, 0, 1, 1], [], []>} : vector<2x32xbf16>, vector<32x96xbf16>, vector<2x96xf32> -> vector<2x96xf32>
    %139 = vector.extract_strided_slice %136 {offsets = [0, 0], sizes = [2, 32], strides = [1, 1]} : vector<2x96xf32> to vector<2x32xf32>
    %140 = vector.extract_strided_slice %138 {offsets = [0, 0], sizes = [2, 32], strides = [1, 1]} : vector<2x96xf32> to vector<2x32xf32>
    %141 = arith.addf %139, %140 : vector<2x32xf32>
    %142 = arith.negf %141 : vector<2x32xf32>
    %143 = math.exp %142 : vector<2x32xf32>
    %cst_27 = arith.constant 1.000000e+00 : f32
    %144 = vector.broadcast %cst_27 : f32 to vector<2x32xf32>
    %145 = arith.addf %144, %143 : vector<2x32xf32>
    %146 = arith.divf %144, %145 : vector<2x32xf32>
    %147 = vector.extract_strided_slice %136 {offsets = [0, 32], sizes = [2, 32], strides = [1, 1]} : vector<2x96xf32> to vector<2x32xf32>
    %148 = vector.extract_strided_slice %138 {offsets = [0, 32], sizes = [2, 32], strides = [1, 1]} : vector<2x96xf32> to vector<2x32xf32>
    %149 = arith.addf %147, %148 : vector<2x32xf32>
    %150 = arith.negf %149 : vector<2x32xf32>
    %151 = math.exp %150 : vector<2x32xf32>
    %cst_28 = arith.constant 1.000000e+00 : f32
    %152 = vector.broadcast %cst_28 : f32 to vector<2x32xf32>
    %153 = arith.addf %152, %151 : vector<2x32xf32>
    %154 = arith.divf %152, %153 : vector<2x32xf32>
    %155 = vector.extract_strided_slice %136 {offsets = [0, 64], sizes = [2, 32], strides = [1, 1]} : vector<2x96xf32> to vector<2x32xf32>
    %156 = vector.extract_strided_slice %138 {offsets = [0, 64], sizes = [2, 32], strides = [1, 1]} : vector<2x96xf32> to vector<2x32xf32>
    %157 = vector.broadcast %10 : vector<1x32xf32> to vector<2x32xf32>
    %158 = arith.addf %156, %157 : vector<2x32xf32>
    %159 = arith.mulf %146, %158 : vector<2x32xf32>
    %160 = arith.addf %155, %159 : vector<2x32xf32>
    %161 = math.tanh %160 : vector<2x32xf32>
    %cst_29 = arith.constant 1.000000e+00 : f32
    %162 = vector.broadcast %cst_29 : f32 to vector<2x32xf32>
    %163 = arith.subf %162, %154 : vector<2x32xf32>
    %164 = arith.mulf %163, %161 : vector<2x32xf32>
    %165 = arith.mulf %154, %135 : vector<2x32xf32>
    %166 = arith.addf %164, %165 : vector<2x32xf32>
    %167 = vector.extract_strided_slice %7 {offsets = [10, 0], sizes = [2, 96], strides = [1, 1]} : vector<16x96xf32> to vector<2x96xf32>
    %168 = arith.truncf %166 : vector<2x32xf32> to vector<2x32xbf16>
    %cst_30 = arith.constant dense<0.000000e+00> : vector<2x96xf32>
    %169 = tpu.matmul %168, %9, %cst_30 {dimension_numbers = #tpu.dot_dimension_numbers<[1], [0], [0], [1], [0, 0, 1, 1], [], []>} : vector<2x32xbf16>, vector<32x96xbf16>, vector<2x96xf32> -> vector<2x96xf32>
    %170 = vector.extract_strided_slice %167 {offsets = [0, 0], sizes = [2, 32], strides = [1, 1]} : vector<2x96xf32> to vector<2x32xf32>
    %171 = vector.extract_strided_slice %169 {offsets = [0, 0], sizes = [2, 32], strides = [1, 1]} : vector<2x96xf32> to vector<2x32xf32>
    %172 = arith.addf %170, %171 : vector<2x32xf32>
    %173 = arith.negf %172 : vector<2x32xf32>
    %174 = math.exp %173 : vector<2x32xf32>
    %cst_31 = arith.constant 1.000000e+00 : f32
    %175 = vector.broadcast %cst_31 : f32 to vector<2x32xf32>
    %176 = arith.addf %175, %174 : vector<2x32xf32>
    %177 = arith.divf %175, %176 : vector<2x32xf32>
    %178 = vector.extract_strided_slice %167 {offsets = [0, 32], sizes = [2, 32], strides = [1, 1]} : vector<2x96xf32> to vector<2x32xf32>
    %179 = vector.extract_strided_slice %169 {offsets = [0, 32], sizes = [2, 32], strides = [1, 1]} : vector<2x96xf32> to vector<2x32xf32>
    %180 = arith.addf %178, %179 : vector<2x32xf32>
    %181 = arith.negf %180 : vector<2x32xf32>
    %182 = math.exp %181 : vector<2x32xf32>
    %cst_32 = arith.constant 1.000000e+00 : f32
    %183 = vector.broadcast %cst_32 : f32 to vector<2x32xf32>
    %184 = arith.addf %183, %182 : vector<2x32xf32>
    %185 = arith.divf %183, %184 : vector<2x32xf32>
    %186 = vector.extract_strided_slice %167 {offsets = [0, 64], sizes = [2, 32], strides = [1, 1]} : vector<2x96xf32> to vector<2x32xf32>
    %187 = vector.extract_strided_slice %169 {offsets = [0, 64], sizes = [2, 32], strides = [1, 1]} : vector<2x96xf32> to vector<2x32xf32>
    %188 = vector.broadcast %10 : vector<1x32xf32> to vector<2x32xf32>
    %189 = arith.addf %187, %188 : vector<2x32xf32>
    %190 = arith.mulf %177, %189 : vector<2x32xf32>
    %191 = arith.addf %186, %190 : vector<2x32xf32>
    %192 = math.tanh %191 : vector<2x32xf32>
    %cst_33 = arith.constant 1.000000e+00 : f32
    %193 = vector.broadcast %cst_33 : f32 to vector<2x32xf32>
    %194 = arith.subf %193, %185 : vector<2x32xf32>
    %195 = arith.mulf %194, %192 : vector<2x32xf32>
    %196 = arith.mulf %185, %166 : vector<2x32xf32>
    %197 = arith.addf %195, %196 : vector<2x32xf32>
    %198 = vector.extract_strided_slice %7 {offsets = [12, 0], sizes = [2, 96], strides = [1, 1]} : vector<16x96xf32> to vector<2x96xf32>
    %199 = arith.truncf %197 : vector<2x32xf32> to vector<2x32xbf16>
    %cst_34 = arith.constant dense<0.000000e+00> : vector<2x96xf32>
    %200 = tpu.matmul %199, %9, %cst_34 {dimension_numbers = #tpu.dot_dimension_numbers<[1], [0], [0], [1], [0, 0, 1, 1], [], []>} : vector<2x32xbf16>, vector<32x96xbf16>, vector<2x96xf32> -> vector<2x96xf32>
    %201 = vector.extract_strided_slice %198 {offsets = [0, 0], sizes = [2, 32], strides = [1, 1]} : vector<2x96xf32> to vector<2x32xf32>
    %202 = vector.extract_strided_slice %200 {offsets = [0, 0], sizes = [2, 32], strides = [1, 1]} : vector<2x96xf32> to vector<2x32xf32>
    %203 = arith.addf %201, %202 : vector<2x32xf32>
    %204 = arith.negf %203 : vector<2x32xf32>
    %205 = math.exp %204 : vector<2x32xf32>
    %cst_35 = arith.constant 1.000000e+00 : f32
    %206 = vector.broadcast %cst_35 : f32 to vector<2x32xf32>
    %207 = arith.addf %206, %205 : vector<2x32xf32>
    %208 = arith.divf %206, %207 : vector<2x32xf32>
    %209 = vector.extract_strided_slice %198 {offsets = [0, 32], sizes = [2, 32], strides = [1, 1]} : vector<2x96xf32> to vector<2x32xf32>
    %210 = vector.extract_strided_slice %200 {offsets = [0, 32], sizes = [2, 32], strides = [1, 1]} : vector<2x96xf32> to vector<2x32xf32>
    %211 = arith.addf %209, %210 : vector<2x32xf32>
    %212 = arith.negf %211 : vector<2x32xf32>
    %213 = math.exp %212 : vector<2x32xf32>
    %cst_36 = arith.constant 1.000000e+00 : f32
    %214 = vector.broadcast %cst_36 : f32 to vector<2x32xf32>
    %215 = arith.addf %214, %213 : vector<2x32xf32>
    %216 = arith.divf %214, %215 : vector<2x32xf32>
    %217 = vector.extract_strided_slice %198 {offsets = [0, 64], sizes = [2, 32], strides = [1, 1]} : vector<2x96xf32> to vector<2x32xf32>
    %218 = vector.extract_strided_slice %200 {offsets = [0, 64], sizes = [2, 32], strides = [1, 1]} : vector<2x96xf32> to vector<2x32xf32>
    %219 = vector.broadcast %10 : vector<1x32xf32> to vector<2x32xf32>
    %220 = arith.addf %218, %219 : vector<2x32xf32>
    %221 = arith.mulf %208, %220 : vector<2x32xf32>
    %222 = arith.addf %217, %221 : vector<2x32xf32>
    %223 = math.tanh %222 : vector<2x32xf32>
    %cst_37 = arith.constant 1.000000e+00 : f32
    %224 = vector.broadcast %cst_37 : f32 to vector<2x32xf32>
    %225 = arith.subf %224, %216 : vector<2x32xf32>
    %226 = arith.mulf %225, %223 : vector<2x32xf32>
    %227 = arith.mulf %216, %197 : vector<2x32xf32>
    %228 = arith.addf %226, %227 : vector<2x32xf32>
    %229 = vector.extract_strided_slice %7 {offsets = [14, 0], sizes = [2, 96], strides = [1, 1]} : vector<16x96xf32> to vector<2x96xf32>
    %230 = arith.truncf %228 : vector<2x32xf32> to vector<2x32xbf16>
    %cst_38 = arith.constant dense<0.000000e+00> : vector<2x96xf32>
    %231 = tpu.matmul %230, %9, %cst_38 {dimension_numbers = #tpu.dot_dimension_numbers<[1], [0], [0], [1], [0, 0, 1, 1], [], []>} : vector<2x32xbf16>, vector<32x96xbf16>, vector<2x96xf32> -> vector<2x96xf32>
    %232 = vector.extract_strided_slice %229 {offsets = [0, 0], sizes = [2, 32], strides = [1, 1]} : vector<2x96xf32> to vector<2x32xf32>
    %233 = vector.extract_strided_slice %231 {offsets = [0, 0], sizes = [2, 32], strides = [1, 1]} : vector<2x96xf32> to vector<2x32xf32>
    %234 = arith.addf %232, %233 : vector<2x32xf32>
    %235 = arith.negf %234 : vector<2x32xf32>
    %236 = math.exp %235 : vector<2x32xf32>
    %cst_39 = arith.constant 1.000000e+00 : f32
    %237 = vector.broadcast %cst_39 : f32 to vector<2x32xf32>
    %238 = arith.addf %237, %236 : vector<2x32xf32>
    %239 = arith.divf %237, %238 : vector<2x32xf32>
    %240 = vector.extract_strided_slice %229 {offsets = [0, 32], sizes = [2, 32], strides = [1, 1]} : vector<2x96xf32> to vector<2x32xf32>
    %241 = vector.extract_strided_slice %231 {offsets = [0, 32], sizes = [2, 32], strides = [1, 1]} : vector<2x96xf32> to vector<2x32xf32>
    %242 = arith.addf %240, %241 : vector<2x32xf32>
    %243 = arith.negf %242 : vector<2x32xf32>
    %244 = math.exp %243 : vector<2x32xf32>
    %cst_40 = arith.constant 1.000000e+00 : f32
    %245 = vector.broadcast %cst_40 : f32 to vector<2x32xf32>
    %246 = arith.addf %245, %244 : vector<2x32xf32>
    %247 = arith.divf %245, %246 : vector<2x32xf32>
    %248 = vector.extract_strided_slice %229 {offsets = [0, 64], sizes = [2, 32], strides = [1, 1]} : vector<2x96xf32> to vector<2x32xf32>
    %249 = vector.extract_strided_slice %231 {offsets = [0, 64], sizes = [2, 32], strides = [1, 1]} : vector<2x96xf32> to vector<2x32xf32>
    %250 = vector.broadcast %10 : vector<1x32xf32> to vector<2x32xf32>
    %251 = arith.addf %249, %250 : vector<2x32xf32>
    %252 = arith.mulf %239, %251 : vector<2x32xf32>
    %253 = arith.addf %248, %252 : vector<2x32xf32>
    %254 = math.tanh %253 : vector<2x32xf32>
    %cst_41 = arith.constant 1.000000e+00 : f32
    %255 = vector.broadcast %cst_41 : f32 to vector<2x32xf32>
    %256 = arith.subf %255, %247 : vector<2x32xf32>
    %257 = arith.mulf %256, %254 : vector<2x32xf32>
    %258 = arith.mulf %247, %228 : vector<2x32xf32>
    %259 = arith.addf %257, %258 : vector<2x32xf32>
    %c0_42 = arith.constant 0 : index
    %c0_43 = arith.constant 0 : index
    %260 = vector.load %arg8[%c0_42, %c0_43] : memref<32x8xf32, #tpu.memory_space<vmem>>, vector<32x8xf32>
    %261 = arith.truncf %259 : vector<2x32xf32> to vector<2x32xbf16>
    %262 = arith.truncf %260 : vector<32x8xf32> to vector<32x8xbf16>
    %cst_44 = arith.constant dense<0.000000e+00> : vector<2x8xf32>
    %263 = tpu.matmul %261, %262, %cst_44 {dimension_numbers = #tpu.dot_dimension_numbers<[1], [0], [0], [1], [0, 0, 1, 1], [], []>} : vector<2x32xbf16>, vector<32x8xbf16>, vector<2x8xf32> -> vector<2x8xf32>
    %c0_45 = arith.constant 0 : index
    %c0_46 = arith.constant 0 : index
    %264 = vector.load %arg9[%c0_45, %c0_46] : memref<1x8xf32, #tpu.memory_space<vmem>>, vector<1x8xf32>
    %265 = vector.broadcast %264 : vector<1x8xf32> to vector<2x8xf32>
    %266 = arith.addf %263, %265 : vector<2x8xf32>
    %c0_47 = arith.constant 0 : index
    %c0_48 = arith.constant 0 : index
    %267 = vector.load %arg10[%c0_47, %c0_48] : memref<32x8xf32, #tpu.memory_space<vmem>>, vector<32x8xf32>
    %268 = arith.truncf %259 : vector<2x32xf32> to vector<2x32xbf16>
    %269 = arith.truncf %267 : vector<32x8xf32> to vector<32x8xbf16>
    %cst_49 = arith.constant dense<0.000000e+00> : vector<2x8xf32>
    %270 = tpu.matmul %268, %269, %cst_49 {dimension_numbers = #tpu.dot_dimension_numbers<[1], [0], [0], [1], [0, 0, 1, 1], [], []>} : vector<2x32xbf16>, vector<32x8xbf16>, vector<2x8xf32> -> vector<2x8xf32>
    %c0_50 = arith.constant 0 : index
    %c0_51 = arith.constant 0 : index
    %271 = vector.load %arg11[%c0_50, %c0_51] : memref<1x8xf32, #tpu.memory_space<vmem>>, vector<1x8xf32>
    %272 = vector.broadcast %271 : vector<1x8xf32> to vector<2x8xf32>
    %273 = arith.addf %270, %272 : vector<2x8xf32>
    %cst_52 = arith.constant 5.000000e-01 : f32
    %274 = vector.broadcast %cst_52 : f32 to vector<2x8xf32>
    %275 = arith.mulf %274, %273 : vector<2x8xf32>
    %276 = math.exp %275 : vector<2x8xf32>
    %c0_53 = arith.constant 0 : index
    %c0_54 = arith.constant 0 : index
    %277 = vector.load %arg2[%c0_53, %c0_54] : memref<2x8xf32, #tpu.memory_space<vmem>>, vector<2x8xf32>
    %278 = arith.mulf %276, %277 : vector<2x8xf32>
    %279 = arith.addf %266, %278 : vector<2x8xf32>
    %280 = math.exp %273 : vector<2x8xf32>
    %281 = arith.mulf %266, %266 : vector<2x8xf32>
    %282 = arith.addf %280, %281 : vector<2x8xf32>
    %cst_55 = arith.constant 1.000000e+00 : f32
    %283 = vector.broadcast %cst_55 : f32 to vector<2x8xf32>
    %284 = arith.subf %282, %283 : vector<2x8xf32>
    %285 = arith.subf %284, %273 : vector<2x8xf32>
    %cst_56 = arith.constant 5.000000e-01 : f32
    %286 = vector.broadcast %cst_56 : f32 to vector<2x8xf32>
    %287 = arith.mulf %286, %285 : vector<2x8xf32>
    %288 = vector.shape_cast %287 : vector<2x8xf32> to vector<1x2x8xf32>
    %cst_57 = arith.constant dense<0.000000e+00> : vector<1xf32>
    %289 = vector.multi_reduction <add>, %288, %cst_57 [1, 2] : vector<1x2x8xf32> to vector<1xf32>
    %290 = vector.shape_cast %289 : vector<1xf32> to vector<1x1x1xf32>
    %291 = vector.extract %290[0, 0, 0] : f32 from vector<1x1x1xf32>
    %cst_58 = arith.constant 5.000000e-01 : f32
    %292 = arith.mulf %291, %cst_58 : f32
    %c0_59 = arith.constant 0 : index
    %c0_60 = arith.constant 0 : index
    %293 = memref.load %arg24[%c0_59, %c0_60] : memref<1x1xf32, #tpu.memory_space<smem>>
    memref.store %292, %arg24[%c0_59, %c0_60] : memref<1x1xf32, #tpu.memory_space<smem>>
    %c0_61 = arith.constant 0 : index
    %c0_62 = arith.constant 0 : index
    %294 = vector.load %arg19[%c0_61, %c0_62] : memref<12x48xf32, #tpu.memory_space<vmem>>, vector<12x48xf32>
    %c0_63 = arith.constant 0 : index
    %c0_64 = arith.constant 0 : index
    %295 = vector.load %arg20[%c0_63, %c0_64] : memref<48x8xf32, #tpu.memory_space<vmem>>, vector<48x8xf32>
    %296 = arith.truncf %294 : vector<12x48xf32> to vector<12x48xbf16>
    %297 = arith.truncf %295 : vector<48x8xf32> to vector<48x8xbf16>
    %cst_65 = arith.constant dense<0.000000e+00> : vector<12x8xf32>
    %298 = tpu.matmul %296, %297, %cst_65 {dimension_numbers = #tpu.dot_dimension_numbers<[1], [0], [0], [1], [0, 0, 1, 1], [], []>} : vector<12x48xbf16>, vector<48x8xbf16>, vector<12x8xf32> -> vector<12x8xf32>
    %c0_66 = arith.constant 0 : index
    %c0_67 = arith.constant 0 : index
    %299 = vector.load %arg21[%c0_66, %c0_67] : memref<1x8xf32, #tpu.memory_space<vmem>>, vector<1x8xf32>
    %300 = vector.broadcast %299 : vector<1x8xf32> to vector<12x8xf32>
    %301 = arith.addf %298, %300 : vector<12x8xf32>
    %cst_68 = arith.constant 0.000000e+00 : f32
    %302 = vector.broadcast %cst_68 : f32 to vector<12x8xf32>
    %303 = arith.maximumf %301, %302 : vector<12x8xf32>
    %304 = vector.extract_strided_slice %303 {offsets = [0, 0], sizes = [2, 8], strides = [1, 1]} : vector<12x8xf32> to vector<2x8xf32>
    %305 = vector.extract_strided_slice %303 {offsets = [2, 0], sizes = [2, 8], strides = [1, 1]} : vector<12x8xf32> to vector<2x8xf32>
    %306 = arith.maximumf %304, %305 : vector<2x8xf32>
    %307 = vector.extract_strided_slice %303 {offsets = [4, 0], sizes = [2, 8], strides = [1, 1]} : vector<12x8xf32> to vector<2x8xf32>
    %308 = arith.maximumf %306, %307 : vector<2x8xf32>
    %309 = vector.extract_strided_slice %303 {offsets = [6, 0], sizes = [2, 8], strides = [1, 1]} : vector<12x8xf32> to vector<2x8xf32>
    %310 = arith.maximumf %308, %309 : vector<2x8xf32>
    %311 = vector.extract_strided_slice %303 {offsets = [8, 0], sizes = [2, 8], strides = [1, 1]} : vector<12x8xf32> to vector<2x8xf32>
    %312 = arith.maximumf %310, %311 : vector<2x8xf32>
    %313 = vector.extract_strided_slice %303 {offsets = [10, 0], sizes = [2, 8], strides = [1, 1]} : vector<12x8xf32> to vector<2x8xf32>
    %314 = arith.maximumf %312, %313 : vector<2x8xf32>
    %c0_69 = arith.constant 0 : index
    %c0_70 = arith.constant 0 : index
    %315 = vector.load %arg22[%c0_69, %c0_70] : memref<8x4xf32, #tpu.memory_space<vmem>>, vector<8x4xf32>
    %316 = arith.truncf %314 : vector<2x8xf32> to vector<2x8xbf16>
    %317 = arith.truncf %315 : vector<8x4xf32> to vector<8x4xbf16>
    %cst_71 = arith.constant dense<0.000000e+00> : vector<2x4xf32>
    %318 = tpu.matmul %316, %317, %cst_71 {dimension_numbers = #tpu.dot_dimension_numbers<[1], [0], [0], [1], [0, 0, 1, 1], [], []>} : vector<2x8xbf16>, vector<8x4xbf16>, vector<2x4xf32> -> vector<2x4xf32>
    %c0_72 = arith.constant 0 : index
    %c0_73 = arith.constant 0 : index
    %319 = vector.load %arg23[%c0_72, %c0_73] : memref<1x4xf32, #tpu.memory_space<vmem>>, vector<1x4xf32>
    %320 = vector.broadcast %319 : vector<1x4xf32> to vector<2x4xf32>
    %321 = arith.addf %318, %320 : vector<2x4xf32>
    %cst_74 = arith.constant dense<0xFF800000> : vector<2xf32>
    %322 = vector.multi_reduction <maximumf>, %321, %cst_74 [1] : vector<2x4xf32> to vector<2xf32>
    %323 = vector.shape_cast %322 : vector<2xf32> to vector<2x1xf32>
    %324 = vector.broadcast %323 : vector<2x1xf32> to vector<2x4xf32>
    %325 = arith.subf %321, %324 : vector<2x4xf32>
    %326 = math.exp %325 : vector<2x4xf32>
    %cst_75 = arith.constant dense<0.000000e+00> : vector<2xf32>
    %327 = vector.multi_reduction <add>, %326, %cst_75 [1] : vector<2x4xf32> to vector<2xf32>
    %328 = vector.shape_cast %327 : vector<2xf32> to vector<2x1xf32>
    %329 = vector.broadcast %328 : vector<2x1xf32> to vector<2x4xf32>
    %330 = arith.divf %326, %329 : vector<2x4xf32>
    %331 = tpu.concatenate %279, %330 in 1 : vector<2x8xf32>, vector<2x4xf32> -> vector<2x12xf32>
    %c0_76 = arith.constant 0 : index
    %c0_77 = arith.constant 0 : index
    %332 = vector.load %arg1[%c0_76, %c0_77] : memref<14x16xf32, #tpu.memory_space<vmem>>, vector<14x16xf32>
    %c0_78 = arith.constant 0 : index
    %c0_79 = arith.constant 0 : index
    %333 = vector.load %arg12[%c0_78, %c0_79] : memref<16x36xf32, #tpu.memory_space<vmem>>, vector<16x36xf32>
    %334 = arith.truncf %332 : vector<14x16xf32> to vector<14x16xbf16>
    %335 = arith.truncf %333 : vector<16x36xf32> to vector<16x36xbf16>
    %cst_80 = arith.constant dense<0.000000e+00> : vector<14x36xf32>
    %336 = tpu.matmul %334, %335, %cst_80 {dimension_numbers = #tpu.dot_dimension_numbers<[1], [0], [0], [1], [0, 0, 1, 1], [], []>} : vector<14x16xbf16>, vector<16x36xbf16>, vector<14x36xf32> -> vector<14x36xf32>
    %c0_81 = arith.constant 0 : index
    %c0_82 = arith.constant 0 : index
    %337 = vector.load %arg13[%c0_81, %c0_82] : memref<12x36xf32, #tpu.memory_space<vmem>>, vector<12x36xf32>
    %338 = arith.truncf %331 : vector<2x12xf32> to vector<2x12xbf16>
    %339 = arith.truncf %337 : vector<12x36xf32> to vector<12x36xbf16>
    %cst_83 = arith.constant dense<0.000000e+00> : vector<2x36xf32>
    %340 = tpu.matmul %338, %339, %cst_83 {dimension_numbers = #tpu.dot_dimension_numbers<[1], [0], [0], [1], [0, 0, 1, 1], [], []>} : vector<2x12xbf16>, vector<12x36xbf16>, vector<2x36xf32> -> vector<2x36xf32>
    %c0_84 = arith.constant 0 : index
    %c0_85 = arith.constant 0 : index
    %341 = vector.load %arg15[%c0_84, %c0_85] : memref<1x36xf32, #tpu.memory_space<vmem>>, vector<1x36xf32>
    %342 = vector.broadcast %341 : vector<1x36xf32> to vector<2x36xf32>
    %343 = arith.addf %340, %342 : vector<2x36xf32>
    %c0_86 = arith.constant 0 : index
    %c0_87 = arith.constant 0 : index
    %344 = vector.load %arg14[%c0_86, %c0_87] : memref<12x36xf32, #tpu.memory_space<vmem>>, vector<12x36xf32>
    %345 = arith.truncf %344 : vector<12x36xf32> to vector<12x36xbf16>
    %c0_88 = arith.constant 0 : index
    %c0_89 = arith.constant 0 : index
    %346 = vector.load %arg16[%c0_88, %c0_89] : memref<1x12xf32, #tpu.memory_space<vmem>>, vector<1x12xf32>
    %347 = vector.extract_strided_slice %336 {offsets = [0, 0], sizes = [2, 36], strides = [1, 1]} : vector<14x36xf32> to vector<2x36xf32>
    %348 = arith.addf %347, %343 : vector<2x36xf32>
    %349 = arith.truncf %331 : vector<2x12xf32> to vector<2x12xbf16>
    %cst_90 = arith.constant dense<0.000000e+00> : vector<2x36xf32>
    %350 = tpu.matmul %349, %345, %cst_90 {dimension_numbers = #tpu.dot_dimension_numbers<[1], [0], [0], [1], [0, 0, 1, 1], [], []>} : vector<2x12xbf16>, vector<12x36xbf16>, vector<2x36xf32> -> vector<2x36xf32>
    %351 = vector.extract_strided_slice %348 {offsets = [0, 0], sizes = [2, 12], strides = [1, 1]} : vector<2x36xf32> to vector<2x12xf32>
    %352 = vector.extract_strided_slice %350 {offsets = [0, 0], sizes = [2, 12], strides = [1, 1]} : vector<2x36xf32> to vector<2x12xf32>
    %353 = arith.addf %351, %352 : vector<2x12xf32>
    %354 = arith.negf %353 : vector<2x12xf32>
    %355 = math.exp %354 : vector<2x12xf32>
    %cst_91 = arith.constant 1.000000e+00 : f32
    %356 = vector.broadcast %cst_91 : f32 to vector<2x12xf32>
    %357 = arith.addf %356, %355 : vector<2x12xf32>
    %358 = arith.divf %356, %357 : vector<2x12xf32>
    %359 = vector.extract_strided_slice %348 {offsets = [0, 12], sizes = [2, 12], strides = [1, 1]} : vector<2x36xf32> to vector<2x12xf32>
    %360 = vector.extract_strided_slice %350 {offsets = [0, 12], sizes = [2, 12], strides = [1, 1]} : vector<2x36xf32> to vector<2x12xf32>
    %361 = arith.addf %359, %360 : vector<2x12xf32>
    %362 = arith.negf %361 : vector<2x12xf32>
    %363 = math.exp %362 : vector<2x12xf32>
    %cst_92 = arith.constant 1.000000e+00 : f32
    %364 = vector.broadcast %cst_92 : f32 to vector<2x12xf32>
    %365 = arith.addf %364, %363 : vector<2x12xf32>
    %366 = arith.divf %364, %365 : vector<2x12xf32>
    %367 = vector.extract_strided_slice %348 {offsets = [0, 24], sizes = [2, 12], strides = [1, 1]} : vector<2x36xf32> to vector<2x12xf32>
    %368 = vector.extract_strided_slice %350 {offsets = [0, 24], sizes = [2, 12], strides = [1, 1]} : vector<2x36xf32> to vector<2x12xf32>
    %369 = vector.broadcast %346 : vector<1x12xf32> to vector<2x12xf32>
    %370 = arith.addf %368, %369 : vector<2x12xf32>
    %371 = arith.mulf %358, %370 : vector<2x12xf32>
    %372 = arith.addf %367, %371 : vector<2x12xf32>
    %373 = math.tanh %372 : vector<2x12xf32>
    %cst_93 = arith.constant 1.000000e+00 : f32
    %374 = vector.broadcast %cst_93 : f32 to vector<2x12xf32>
    %375 = arith.subf %374, %366 : vector<2x12xf32>
    %376 = arith.mulf %375, %373 : vector<2x12xf32>
    %377 = arith.mulf %366, %331 : vector<2x12xf32>
    %378 = arith.addf %376, %377 : vector<2x12xf32>
    %379 = vector.extract_strided_slice %336 {offsets = [2, 0], sizes = [2, 36], strides = [1, 1]} : vector<14x36xf32> to vector<2x36xf32>
    %380 = arith.addf %379, %343 : vector<2x36xf32>
    %381 = arith.truncf %378 : vector<2x12xf32> to vector<2x12xbf16>
    %cst_94 = arith.constant dense<0.000000e+00> : vector<2x36xf32>
    %382 = tpu.matmul %381, %345, %cst_94 {dimension_numbers = #tpu.dot_dimension_numbers<[1], [0], [0], [1], [0, 0, 1, 1], [], []>} : vector<2x12xbf16>, vector<12x36xbf16>, vector<2x36xf32> -> vector<2x36xf32>
    %383 = vector.extract_strided_slice %380 {offsets = [0, 0], sizes = [2, 12], strides = [1, 1]} : vector<2x36xf32> to vector<2x12xf32>
    %384 = vector.extract_strided_slice %382 {offsets = [0, 0], sizes = [2, 12], strides = [1, 1]} : vector<2x36xf32> to vector<2x12xf32>
    %385 = arith.addf %383, %384 : vector<2x12xf32>
    %386 = arith.negf %385 : vector<2x12xf32>
    %387 = math.exp %386 : vector<2x12xf32>
    %cst_95 = arith.constant 1.000000e+00 : f32
    %388 = vector.broadcast %cst_95 : f32 to vector<2x12xf32>
    %389 = arith.addf %388, %387 : vector<2x12xf32>
    %390 = arith.divf %388, %389 : vector<2x12xf32>
    %391 = vector.extract_strided_slice %380 {offsets = [0, 12], sizes = [2, 12], strides = [1, 1]} : vector<2x36xf32> to vector<2x12xf32>
    %392 = vector.extract_strided_slice %382 {offsets = [0, 12], sizes = [2, 12], strides = [1, 1]} : vector<2x36xf32> to vector<2x12xf32>
    %393 = arith.addf %391, %392 : vector<2x12xf32>
    %394 = arith.negf %393 : vector<2x12xf32>
    %395 = math.exp %394 : vector<2x12xf32>
    %cst_96 = arith.constant 1.000000e+00 : f32
    %396 = vector.broadcast %cst_96 : f32 to vector<2x12xf32>
    %397 = arith.addf %396, %395 : vector<2x12xf32>
    %398 = arith.divf %396, %397 : vector<2x12xf32>
    %399 = vector.extract_strided_slice %380 {offsets = [0, 24], sizes = [2, 12], strides = [1, 1]} : vector<2x36xf32> to vector<2x12xf32>
    %400 = vector.extract_strided_slice %382 {offsets = [0, 24], sizes = [2, 12], strides = [1, 1]} : vector<2x36xf32> to vector<2x12xf32>
    %401 = vector.broadcast %346 : vector<1x12xf32> to vector<2x12xf32>
    %402 = arith.addf %400, %401 : vector<2x12xf32>
    %403 = arith.mulf %390, %402 : vector<2x12xf32>
    %404 = arith.addf %399, %403 : vector<2x12xf32>
    %405 = math.tanh %404 : vector<2x12xf32>
    %cst_97 = arith.constant 1.000000e+00 : f32
    %406 = vector.broadcast %cst_97 : f32 to vector<2x12xf32>
    %407 = arith.subf %406, %398 : vector<2x12xf32>
    %408 = arith.mulf %407, %405 : vector<2x12xf32>
    %409 = arith.mulf %398, %378 : vector<2x12xf32>
    %410 = arith.addf %408, %409 : vector<2x12xf32>
    %411 = vector.extract_strided_slice %336 {offsets = [4, 0], sizes = [2, 36], strides = [1, 1]} : vector<14x36xf32> to vector<2x36xf32>
    %412 = arith.addf %411, %343 : vector<2x36xf32>
    %413 = arith.truncf %410 : vector<2x12xf32> to vector<2x12xbf16>
    %cst_98 = arith.constant dense<0.000000e+00> : vector<2x36xf32>
    %414 = tpu.matmul %413, %345, %cst_98 {dimension_numbers = #tpu.dot_dimension_numbers<[1], [0], [0], [1], [0, 0, 1, 1], [], []>} : vector<2x12xbf16>, vector<12x36xbf16>, vector<2x36xf32> -> vector<2x36xf32>
    %415 = vector.extract_strided_slice %412 {offsets = [0, 0], sizes = [2, 12], strides = [1, 1]} : vector<2x36xf32> to vector<2x12xf32>
    %416 = vector.extract_strided_slice %414 {offsets = [0, 0], sizes = [2, 12], strides = [1, 1]} : vector<2x36xf32> to vector<2x12xf32>
    %417 = arith.addf %415, %416 : vector<2x12xf32>
    %418 = arith.negf %417 : vector<2x12xf32>
    %419 = math.exp %418 : vector<2x12xf32>
    %cst_99 = arith.constant 1.000000e+00 : f32
    %420 = vector.broadcast %cst_99 : f32 to vector<2x12xf32>
    %421 = arith.addf %420, %419 : vector<2x12xf32>
    %422 = arith.divf %420, %421 : vector<2x12xf32>
    %423 = vector.extract_strided_slice %412 {offsets = [0, 12], sizes = [2, 12], strides = [1, 1]} : vector<2x36xf32> to vector<2x12xf32>
    %424 = vector.extract_strided_slice %414 {offsets = [0, 12], sizes = [2, 12], strides = [1, 1]} : vector<2x36xf32> to vector<2x12xf32>
    %425 = arith.addf %423, %424 : vector<2x12xf32>
    %426 = arith.negf %425 : vector<2x12xf32>
    %427 = math.exp %426 : vector<2x12xf32>
    %cst_100 = arith.constant 1.000000e+00 : f32
    %428 = vector.broadcast %cst_100 : f32 to vector<2x12xf32>
    %429 = arith.addf %428, %427 : vector<2x12xf32>
    %430 = arith.divf %428, %429 : vector<2x12xf32>
    %431 = vector.extract_strided_slice %412 {offsets = [0, 24], sizes = [2, 12], strides = [1, 1]} : vector<2x36xf32> to vector<2x12xf32>
    %432 = vector.extract_strided_slice %414 {offsets = [0, 24], sizes = [2, 12], strides = [1, 1]} : vector<2x36xf32> to vector<2x12xf32>
    %433 = vector.broadcast %346 : vector<1x12xf32> to vector<2x12xf32>
    %434 = arith.addf %432, %433 : vector<2x12xf32>
    %435 = arith.mulf %422, %434 : vector<2x12xf32>
    %436 = arith.addf %431, %435 : vector<2x12xf32>
    %437 = math.tanh %436 : vector<2x12xf32>
    %cst_101 = arith.constant 1.000000e+00 : f32
    %438 = vector.broadcast %cst_101 : f32 to vector<2x12xf32>
    %439 = arith.subf %438, %430 : vector<2x12xf32>
    %440 = arith.mulf %439, %437 : vector<2x12xf32>
    %441 = arith.mulf %430, %410 : vector<2x12xf32>
    %442 = arith.addf %440, %441 : vector<2x12xf32>
    %443 = vector.extract_strided_slice %336 {offsets = [6, 0], sizes = [2, 36], strides = [1, 1]} : vector<14x36xf32> to vector<2x36xf32>
    %444 = arith.addf %443, %343 : vector<2x36xf32>
    %445 = arith.truncf %442 : vector<2x12xf32> to vector<2x12xbf16>
    %cst_102 = arith.constant dense<0.000000e+00> : vector<2x36xf32>
    %446 = tpu.matmul %445, %345, %cst_102 {dimension_numbers = #tpu.dot_dimension_numbers<[1], [0], [0], [1], [0, 0, 1, 1], [], []>} : vector<2x12xbf16>, vector<12x36xbf16>, vector<2x36xf32> -> vector<2x36xf32>
    %447 = vector.extract_strided_slice %444 {offsets = [0, 0], sizes = [2, 12], strides = [1, 1]} : vector<2x36xf32> to vector<2x12xf32>
    %448 = vector.extract_strided_slice %446 {offsets = [0, 0], sizes = [2, 12], strides = [1, 1]} : vector<2x36xf32> to vector<2x12xf32>
    %449 = arith.addf %447, %448 : vector<2x12xf32>
    %450 = arith.negf %449 : vector<2x12xf32>
    %451 = math.exp %450 : vector<2x12xf32>
    %cst_103 = arith.constant 1.000000e+00 : f32
    %452 = vector.broadcast %cst_103 : f32 to vector<2x12xf32>
    %453 = arith.addf %452, %451 : vector<2x12xf32>
    %454 = arith.divf %452, %453 : vector<2x12xf32>
    %455 = vector.extract_strided_slice %444 {offsets = [0, 12], sizes = [2, 12], strides = [1, 1]} : vector<2x36xf32> to vector<2x12xf32>
    %456 = vector.extract_strided_slice %446 {offsets = [0, 12], sizes = [2, 12], strides = [1, 1]} : vector<2x36xf32> to vector<2x12xf32>
    %457 = arith.addf %455, %456 : vector<2x12xf32>
    %458 = arith.negf %457 : vector<2x12xf32>
    %459 = math.exp %458 : vector<2x12xf32>
    %cst_104 = arith.constant 1.000000e+00 : f32
    %460 = vector.broadcast %cst_104 : f32 to vector<2x12xf32>
    %461 = arith.addf %460, %459 : vector<2x12xf32>
    %462 = arith.divf %460, %461 : vector<2x12xf32>
    %463 = vector.extract_strided_slice %444 {offsets = [0, 24], sizes = [2, 12], strides = [1, 1]} : vector<2x36xf32> to vector<2x12xf32>
    %464 = vector.extract_strided_slice %446 {offsets = [0, 24], sizes = [2, 12], strides = [1, 1]} : vector<2x36xf32> to vector<2x12xf32>
    %465 = vector.broadcast %346 : vector<1x12xf32> to vector<2x12xf32>
    %466 = arith.addf %464, %465 : vector<2x12xf32>
    %467 = arith.mulf %454, %466 : vector<2x12xf32>
    %468 = arith.addf %463, %467 : vector<2x12xf32>
    %469 = math.tanh %468 : vector<2x12xf32>
    %cst_105 = arith.constant 1.000000e+00 : f32
    %470 = vector.broadcast %cst_105 : f32 to vector<2x12xf32>
    %471 = arith.subf %470, %462 : vector<2x12xf32>
    %472 = arith.mulf %471, %469 : vector<2x12xf32>
    %473 = arith.mulf %462, %442 : vector<2x12xf32>
    %474 = arith.addf %472, %473 : vector<2x12xf32>
    %475 = vector.extract_strided_slice %336 {offsets = [8, 0], sizes = [2, 36], strides = [1, 1]} : vector<14x36xf32> to vector<2x36xf32>
    %476 = arith.addf %475, %343 : vector<2x36xf32>
    %477 = arith.truncf %474 : vector<2x12xf32> to vector<2x12xbf16>
    %cst_106 = arith.constant dense<0.000000e+00> : vector<2x36xf32>
    %478 = tpu.matmul %477, %345, %cst_106 {dimension_numbers = #tpu.dot_dimension_numbers<[1], [0], [0], [1], [0, 0, 1, 1], [], []>} : vector<2x12xbf16>, vector<12x36xbf16>, vector<2x36xf32> -> vector<2x36xf32>
    %479 = vector.extract_strided_slice %476 {offsets = [0, 0], sizes = [2, 12], strides = [1, 1]} : vector<2x36xf32> to vector<2x12xf32>
    %480 = vector.extract_strided_slice %478 {offsets = [0, 0], sizes = [2, 12], strides = [1, 1]} : vector<2x36xf32> to vector<2x12xf32>
    %481 = arith.addf %479, %480 : vector<2x12xf32>
    %482 = arith.negf %481 : vector<2x12xf32>
    %483 = math.exp %482 : vector<2x12xf32>
    %cst_107 = arith.constant 1.000000e+00 : f32
    %484 = vector.broadcast %cst_107 : f32 to vector<2x12xf32>
    %485 = arith.addf %484, %483 : vector<2x12xf32>
    %486 = arith.divf %484, %485 : vector<2x12xf32>
    %487 = vector.extract_strided_slice %476 {offsets = [0, 12], sizes = [2, 12], strides = [1, 1]} : vector<2x36xf32> to vector<2x12xf32>
    %488 = vector.extract_strided_slice %478 {offsets = [0, 12], sizes = [2, 12], strides = [1, 1]} : vector<2x36xf32> to vector<2x12xf32>
    %489 = arith.addf %487, %488 : vector<2x12xf32>
    %490 = arith.negf %489 : vector<2x12xf32>
    %491 = math.exp %490 : vector<2x12xf32>
    %cst_108 = arith.constant 1.000000e+00 : f32
    %492 = vector.broadcast %cst_108 : f32 to vector<2x12xf32>
    %493 = arith.addf %492, %491 : vector<2x12xf32>
    %494 = arith.divf %492, %493 : vector<2x12xf32>
    %495 = vector.extract_strided_slice %476 {offsets = [0, 24], sizes = [2, 12], strides = [1, 1]} : vector<2x36xf32> to vector<2x12xf32>
    %496 = vector.extract_strided_slice %478 {offsets = [0, 24], sizes = [2, 12], strides = [1, 1]} : vector<2x36xf32> to vector<2x12xf32>
    %497 = vector.broadcast %346 : vector<1x12xf32> to vector<2x12xf32>
    %498 = arith.addf %496, %497 : vector<2x12xf32>
    %499 = arith.mulf %486, %498 : vector<2x12xf32>
    %500 = arith.addf %495, %499 : vector<2x12xf32>
    %501 = math.tanh %500 : vector<2x12xf32>
    %cst_109 = arith.constant 1.000000e+00 : f32
    %502 = vector.broadcast %cst_109 : f32 to vector<2x12xf32>
    %503 = arith.subf %502, %494 : vector<2x12xf32>
    %504 = arith.mulf %503, %501 : vector<2x12xf32>
    %505 = arith.mulf %494, %474 : vector<2x12xf32>
    %506 = arith.addf %504, %505 : vector<2x12xf32>
    %507 = vector.extract_strided_slice %336 {offsets = [10, 0], sizes = [2, 36], strides = [1, 1]} : vector<14x36xf32> to vector<2x36xf32>
    %508 = arith.addf %507, %343 : vector<2x36xf32>
    %509 = arith.truncf %506 : vector<2x12xf32> to vector<2x12xbf16>
    %cst_110 = arith.constant dense<0.000000e+00> : vector<2x36xf32>
    %510 = tpu.matmul %509, %345, %cst_110 {dimension_numbers = #tpu.dot_dimension_numbers<[1], [0], [0], [1], [0, 0, 1, 1], [], []>} : vector<2x12xbf16>, vector<12x36xbf16>, vector<2x36xf32> -> vector<2x36xf32>
    %511 = vector.extract_strided_slice %508 {offsets = [0, 0], sizes = [2, 12], strides = [1, 1]} : vector<2x36xf32> to vector<2x12xf32>
    %512 = vector.extract_strided_slice %510 {offsets = [0, 0], sizes = [2, 12], strides = [1, 1]} : vector<2x36xf32> to vector<2x12xf32>
    %513 = arith.addf %511, %512 : vector<2x12xf32>
    %514 = arith.negf %513 : vector<2x12xf32>
    %515 = math.exp %514 : vector<2x12xf32>
    %cst_111 = arith.constant 1.000000e+00 : f32
    %516 = vector.broadcast %cst_111 : f32 to vector<2x12xf32>
    %517 = arith.addf %516, %515 : vector<2x12xf32>
    %518 = arith.divf %516, %517 : vector<2x12xf32>
    %519 = vector.extract_strided_slice %508 {offsets = [0, 12], sizes = [2, 12], strides = [1, 1]} : vector<2x36xf32> to vector<2x12xf32>
    %520 = vector.extract_strided_slice %510 {offsets = [0, 12], sizes = [2, 12], strides = [1, 1]} : vector<2x36xf32> to vector<2x12xf32>
    %521 = arith.addf %519, %520 : vector<2x12xf32>
    %522 = arith.negf %521 : vector<2x12xf32>
    %523 = math.exp %522 : vector<2x12xf32>
    %cst_112 = arith.constant 1.000000e+00 : f32
    %524 = vector.broadcast %cst_112 : f32 to vector<2x12xf32>
    %525 = arith.addf %524, %523 : vector<2x12xf32>
    %526 = arith.divf %524, %525 : vector<2x12xf32>
    %527 = vector.extract_strided_slice %508 {offsets = [0, 24], sizes = [2, 12], strides = [1, 1]} : vector<2x36xf32> to vector<2x12xf32>
    %528 = vector.extract_strided_slice %510 {offsets = [0, 24], sizes = [2, 12], strides = [1, 1]} : vector<2x36xf32> to vector<2x12xf32>
    %529 = vector.broadcast %346 : vector<1x12xf32> to vector<2x12xf32>
    %530 = arith.addf %528, %529 : vector<2x12xf32>
    %531 = arith.mulf %518, %530 : vector<2x12xf32>
    %532 = arith.addf %527, %531 : vector<2x12xf32>
    %533 = math.tanh %532 : vector<2x12xf32>
    %cst_113 = arith.constant 1.000000e+00 : f32
    %534 = vector.broadcast %cst_113 : f32 to vector<2x12xf32>
    %535 = arith.subf %534, %526 : vector<2x12xf32>
    %536 = arith.mulf %535, %533 : vector<2x12xf32>
    %537 = arith.mulf %526, %506 : vector<2x12xf32>
    %538 = arith.addf %536, %537 : vector<2x12xf32>
    %539 = vector.extract_strided_slice %336 {offsets = [12, 0], sizes = [2, 36], strides = [1, 1]} : vector<14x36xf32> to vector<2x36xf32>
    %540 = arith.addf %539, %343 : vector<2x36xf32>
    %541 = arith.truncf %538 : vector<2x12xf32> to vector<2x12xbf16>
    %cst_114 = arith.constant dense<0.000000e+00> : vector<2x36xf32>
    %542 = tpu.matmul %541, %345, %cst_114 {dimension_numbers = #tpu.dot_dimension_numbers<[1], [0], [0], [1], [0, 0, 1, 1], [], []>} : vector<2x12xbf16>, vector<12x36xbf16>, vector<2x36xf32> -> vector<2x36xf32>
    %543 = vector.extract_strided_slice %540 {offsets = [0, 0], sizes = [2, 12], strides = [1, 1]} : vector<2x36xf32> to vector<2x12xf32>
    %544 = vector.extract_strided_slice %542 {offsets = [0, 0], sizes = [2, 12], strides = [1, 1]} : vector<2x36xf32> to vector<2x12xf32>
    %545 = arith.addf %543, %544 : vector<2x12xf32>
    %546 = arith.negf %545 : vector<2x12xf32>
    %547 = math.exp %546 : vector<2x12xf32>
    %cst_115 = arith.constant 1.000000e+00 : f32
    %548 = vector.broadcast %cst_115 : f32 to vector<2x12xf32>
    %549 = arith.addf %548, %547 : vector<2x12xf32>
    %550 = arith.divf %548, %549 : vector<2x12xf32>
    %551 = vector.extract_strided_slice %540 {offsets = [0, 12], sizes = [2, 12], strides = [1, 1]} : vector<2x36xf32> to vector<2x12xf32>
    %552 = vector.extract_strided_slice %542 {offsets = [0, 12], sizes = [2, 12], strides = [1, 1]} : vector<2x36xf32> to vector<2x12xf32>
    %553 = arith.addf %551, %552 : vector<2x12xf32>
    %554 = arith.negf %553 : vector<2x12xf32>
    %555 = math.exp %554 : vector<2x12xf32>
    %cst_116 = arith.constant 1.000000e+00 : f32
    %556 = vector.broadcast %cst_116 : f32 to vector<2x12xf32>
    %557 = arith.addf %556, %555 : vector<2x12xf32>
    %558 = arith.divf %556, %557 : vector<2x12xf32>
    %559 = vector.extract_strided_slice %540 {offsets = [0, 24], sizes = [2, 12], strides = [1, 1]} : vector<2x36xf32> to vector<2x12xf32>
    %560 = vector.extract_strided_slice %542 {offsets = [0, 24], sizes = [2, 12], strides = [1, 1]} : vector<2x36xf32> to vector<2x12xf32>
    %561 = vector.broadcast %346 : vector<1x12xf32> to vector<2x12xf32>
    %562 = arith.addf %560, %561 : vector<2x12xf32>
    %563 = arith.mulf %550, %562 : vector<2x12xf32>
    %564 = arith.addf %559, %563 : vector<2x12xf32>
    %565 = math.tanh %564 : vector<2x12xf32>
    %cst_117 = arith.constant 1.000000e+00 : f32
    %566 = vector.broadcast %cst_117 : f32 to vector<2x12xf32>
    %567 = arith.subf %566, %558 : vector<2x12xf32>
    %568 = arith.mulf %567, %565 : vector<2x12xf32>
    %569 = arith.mulf %558, %538 : vector<2x12xf32>
    %570 = arith.addf %568, %569 : vector<2x12xf32>
    %571 = tpu.concatenate %378, %410, %442, %474, %506, %538, %570 in 0 : vector<2x12xf32>, vector<2x12xf32>, vector<2x12xf32>, vector<2x12xf32>, vector<2x12xf32>, vector<2x12xf32>, vector<2x12xf32> -> vector<14x12xf32>
    %c0_118 = arith.constant 0 : index
    %c0_119 = arith.constant 0 : index
    %572 = vector.load %arg17[%c0_118, %c0_119] : memref<12x32xf32, #tpu.memory_space<vmem>>, vector<12x32xf32>
    %573 = arith.truncf %571 : vector<14x12xf32> to vector<14x12xbf16>
    %574 = arith.truncf %572 : vector<12x32xf32> to vector<12x32xbf16>
    %cst_120 = arith.constant dense<0.000000e+00> : vector<14x32xf32>
    %575 = tpu.matmul %573, %574, %cst_120 {dimension_numbers = #tpu.dot_dimension_numbers<[1], [0], [0], [1], [0, 0, 1, 1], [], []>} : vector<14x12xbf16>, vector<12x32xbf16>, vector<14x32xf32> -> vector<14x32xf32>
    %c0_121 = arith.constant 0 : index
    %c0_122 = arith.constant 0 : index
    %576 = vector.load %arg18[%c0_121, %c0_122] : memref<1x32xf32, #tpu.memory_space<vmem>>, vector<1x32xf32>
    %577 = vector.broadcast %576 : vector<1x32xf32> to vector<14x32xf32>
    %578 = arith.addf %575, %577 : vector<14x32xf32>
    %cst_123 = arith.constant dense<0xFF800000> : vector<14xf32>
    %579 = vector.multi_reduction <maximumf>, %578, %cst_123 [1] : vector<14x32xf32> to vector<14xf32>
    %580 = vector.shape_cast %579 : vector<14xf32> to vector<14x1xf32>
    %581 = vector.broadcast %580 : vector<14x1xf32> to vector<14x32xf32>
    %582 = arith.subf %578, %581 : vector<14x32xf32>
    %583 = math.exp %582 : vector<14x32xf32>
    %cst_124 = arith.constant dense<0.000000e+00> : vector<14xf32>
    %584 = vector.multi_reduction <add>, %583, %cst_124 [1] : vector<14x32xf32> to vector<14xf32>
    %585 = vector.shape_cast %584 : vector<14xf32> to vector<14x1xf32>
    %586 = math.log %585 : vector<14x1xf32>
    %587 = arith.addf %580, %586 : vector<14x1xf32>
    %588 = tpu.iota {dimensions = array<i32: 1>} : vector<14x32xi32>
    %c0_125 = arith.constant 0 : index
    %c0_126 = arith.constant 0 : index
    %589 = vector.load %arg3[%c0_125, %c0_126] : memref<14x1xi32, #tpu.memory_space<vmem>>, vector<14x1xi32>
    %590 = vector.broadcast %589 : vector<14x1xi32> to vector<14x32xi32>
    %591 = arith.cmpi eq, %588, %590 : vector<14x32xi32>
    %cst_127 = arith.constant 0.000000e+00 : f32
    %592 = vector.broadcast %cst_127 : f32 to vector<14x32xf32>
    %593 = arith.select %591, %578, %592 : vector<14x32xi1>, vector<14x32xf32>
    %cst_128 = arith.constant dense<0.000000e+00> : vector<14xf32>
    %594 = vector.multi_reduction <add>, %593, %cst_128 [1] : vector<14x32xf32> to vector<14xf32>
    %595 = vector.shape_cast %594 : vector<14xf32> to vector<14x1xf32>
    %596 = arith.subf %587, %595 : vector<14x1xf32>
    %597 = vector.shape_cast %596 : vector<14x1xf32> to vector<1x14x1xf32>
    %cst_129 = arith.constant dense<0.000000e+00> : vector<1xf32>
    %598 = vector.multi_reduction <add>, %597, %cst_129 [1, 2] : vector<1x14x1xf32> to vector<1xf32>
    %599 = vector.shape_cast %598 : vector<1xf32> to vector<1x1x1xf32>
    %600 = vector.extract %599[0, 0, 0] : f32 from vector<1x1x1xf32>
    %cst_130 = arith.constant 0.0714285746 : f32
    %601 = arith.mulf %600, %cst_130 : f32
    %c0_131 = arith.constant 0 : index
    %c0_132 = arith.constant 0 : index
    %602 = memref.load %arg25[%c0_131, %c0_132] : memref<1x1xf32, #tpu.memory_space<smem>>
    memref.store %601, %arg25[%c0_131, %c0_132] : memref<1x1xf32, #tpu.memory_space<smem>>
    return
  }
}

</mosaic_0001>

<bundles_post_ra>
// kernel: rnn_vae_forward.3
= control target key start
LH: loop header
LB: loop body
LE: loop exit
PB: predicated region body
PF: predicated region fallthrough
CT: control target
= control target key end

     0   :  { %s2961_s0 = inlined_call_operand.vmem [shape: f32[16,16], index: 0, kind: input, shape index: {}]   ;;  %s2962_s1 = inlined_call_operand.vmem [shape: f32[14,16], index: 1, kind: input, shape index: {}]   ;;  %s2963_s2 = inlined_call_operand.vmem [shape: f32[2,8], index: 2, kind: input, shape index: {}]   ;;  %s2964_s3 = inlined_call_operand.vmem [shape: s32[14,1], index: 3, kind: input, shape index: {}]   ;;  %s2965_s4 = inlined_call_operand.vmem [shape: f32[16,96], index: 4, kind: input, shape index: {}]   ;;  %s2966_s5 = inlined_call_operand.vmem [shape: f32[32,96], index: 5, kind: input, shape index: {}]   ;;  %s2967_s6 = inlined_call_operand.vmem [shape: f32[1,96], index: 6, kind: input, shape index: {}]   ;;  %s2968_s7 = inlined_call_operand.vmem [shape: f32[1,32], index: 7, kind: input, shape index: {}]   ;;  %s2969_s8 = inlined_call_operand.vmem [shape: f32[32,8], index: 8, kind: input, shape index: {}]   ;;  %s2970_s9 = inlined_call_operand.vmem [shape: f32[1,8], index: 9, kind: input, shape index: {}]   ;;  %s2971_s10 = inlined_call_operand.vmem [shape: f32[32,8], index: 10, kind: input, shape index: {}]   ;;  %s2972_s11 = inlined_call_operand.vmem [shape: f32[1,8], index: 11, kind: input, shape index: {}]   ;;  %s2973_s12 = inlined_call_operand.vmem [shape: f32[16,36], index: 12, kind: input, shape index: {}]   ;;  %s2974_s13 = inlined_call_operand.vmem [shape: f32[12,36], index: 13, kind: input, shape index: {}]   ;;  %s2975_s14 = inlined_call_operand.vmem [shape: f32[12,36], index: 14, kind: input, shape index: {}]   ;;  %s2976_s15 = inlined_call_operand.vmem [shape: f32[1,36], index: 15, kind: input, shape index: {}]   ;;  %s2977_s16 = inlined_call_operand.vmem [shape: f32[1,12], index: 16, kind: input, shape index: {}]   ;;  %s2978_s17 = inlined_call_operand.vmem [shape: f32[12,32], index: 17, kind: input, shape index: {}]   ;;  %s2979_s18 = inlined_call_operand.vmem [shape: f32[1,32], index: 18, kind: input, shape index: {}]   ;;  %s2980_s19 = inlined_call_operand.vmem [shape: f32[12,48], index: 19, kind: input, shape index: {}]   ;;  %s2981_s20 = inlined_call_operand.vmem [shape: f32[48,8], index: 20, kind: input, shape index: {}]   ;;  %s2982_s21 = inlined_call_operand.vmem [shape: f32[1,8], index: 21, kind: input, shape index: {}]   ;;  %s2983_s22 = inlined_call_operand.vmem [shape: f32[8,4], index: 22, kind: input, shape index: {}]   ;;  %s2984_s23 = inlined_call_operand.vmem [shape: f32[1,4], index: 23, kind: input, shape index: {}]   ;;  %s2985_s24 = inlined_call_operand.hbm [shape: f32[1,1], index: 24, kind: output, shape index: {0}]   ;;  %s2986_s25 = inlined_call_operand.hbm [shape: f32[1,1], index: 25, kind: output, shape index: {1}]  }
   0x1   :  { %2993 = sst [smem:[#allocation8_spill]] %s2961_s0 }
   0x2   :  { %2994 = sst [smem:[#allocation9_spill]] %s2962_s1 }
   0x3   :  { %2995 = sst [smem:[#allocation10_spill]] %s2963_s2 }
   0x4   :  { %2996 = sst [smem:[#allocation11_spill]] %s2964_s3 }
   0x5   :  { %2997 = sst [smem:[#allocation12_spill]] %s2965_s4 }
   0x6   :  { %2998 = sst [smem:[#allocation13_spill]] %s2966_s5 }
   0x7   :  { %2999 = sst [smem:[#allocation14_spill]] %s2967_s6 }
   0x8   :  { %3000 = sst [smem:[#allocation15_spill]] %s2968_s7 }
   0x9   :  { %3001 = sst [smem:[#allocation16_spill]] %s2969_s8 }
   0xa   :  { %3002 = sst [smem:[#allocation17_spill]] %s2970_s9 }
   0xb   :  { %31 = vsyncpa [#allocation3], 0  ;;  %s3003_s6 = sld [smem:[#allocation13_spill]]  ;;  %s3004_s1 = sld [smem:[#allocation12_spill]]  ;;  %v2357_v3 = vmov 0.0   ;;  %vm2358_vm0 = vmmov 0  }
   0xc   :  { %2053 = vmatprep.subr.bf16.mxu1 %v2357_v3  ;;  %2047 = vmatprep.subr.bf16.mxu0 %v2357_v3  ;;  %s3005_s2 = sld [smem:[#allocation8_spill]] }
   0xd   :  { %2049 = vmatprep.mubr.msk.bf16.mxu0 %vm2358_vm0, %v2357_v3  ;;  %2057 = vmatprep.mubr.msk.bf16.mxu1 %vm2358_vm0, %v2357_v3 }
  0x11   :  { %v140_v0 = vld [vmem:[%s3003_s6] sm:$0xff]  ;;  %v141_v1 = vld [vmem:[%s3003_s6 + $0x8] sm:$0xff]  ;;  %v142_v6 = vld [vmem:[%s3003_s6 + $0x10] sm:$0xff] }
  0x12   :  { %v84_v2 = vld [vmem:[%s3004_s1] sm:$0xff]  ;;  %v2509_v4 = vpack.c.bf16 %v141_v1, %v140_v0  ;;  %v85_v5 = vld [vmem:[%s3004_s1 + $0x8] sm:$0xff]  ;;  %v143_v7 = vld [vmem:[%s3003_s6 + $0x18] sm:$0xff]  ;;  %s3006_s1 = sld [smem:[#allocation15_spill]]  ;;  %s2359_s6 = smov 64  }
  0x13   :  { %v87_v8 = vpack.c.bf16 %v85_v5, %v84_v2  ;;  %v82_v9 = vld [vmem:[%s3005_s2] sm:$0xff]  ;;  %v83_v10 = vld [vmem:[%s3005_s2 + $0x8] sm:$0xff]  ;;  %v2535_v12 = vpack.c.bf16 %v143_v7, %v142_v6 }
  0x14   :  { %2054 = vmatpush3.bf16.msra.mxu1 %v2509_v4  ;;  %v86_v13 = vpack.c.bf16 %v83_v10, %v82_v9 }
  0x18   :  { %v1945_v11 = vld [vmem:[%s3006_s1] ss:$0 sm:$0xff] }
  0x19   :  { %203 = vrot.lane.b32.xlu0 %v1945_v11, %s2359_s6 }
  0x1a   :  { %32 = vsyncpa [#allocation5], 0  ;;  %2048 = vmatpush3.bf16.msra.mxu0 %v87_v8  ;;  %2055 = vmatprep.subr.bf16.mxu1 %v2357_v3  ;;  %vm95_vm1 = vcmask 130048   ;;  %v2360_v14 = vmov 0   ;;  %s3007_s4 = sld [smem:[#allocation14_spill]]  ;;  %s2361_s28 = smov 96  }
  0x1b   :  { %2061 = vmatprep.subr.bf16.mxu0 %v2357_v3  ;;  %2226 = vset.pattern.permute.xlu1 %v2360_v14  ;;  %vm147_vm2 = vcmask 261120   ;;  %s3008_s0 = sld [smem:[#allocation16_spill]]  ;;  %vm954_vm3 = vcmask 392192   ;;  %vm1030_vm4 = vcmask 1043456   ;;  %s3009_s30 = sld [smem:[#allocation17_spill]]  ;;  %vm1026_vm5 = vcmask 64512  }
  0x1c   :  { %2225 = vset.pattern.permute.xlu0 %v2360_v14  ;;  %2056 = vmatpush3.bf16.msra.mxu1 %v2535_v12  ;;  %s3010_s1 = sld [smem:[#allocation10_spill]]  ;;  %vm1074_vm6 = vcmask 25600   ;;  %s3011_s5 = sld [smem:[#allocation9_spill]]  ;;  %vm1156_vm7 = vcmask 1045504   ;;  %vm1152_vm8 = vcmask 97280   ;;  %vm1786_vm9 = vcmask 1041408  }
  0x1d   :  { %2050 = vmatmul.mubr.msk.bf16.vlgmr.msra.gmra.mrb[0].mxu0 %vm95_vm1, %v86_v13  ;;  %2069 = vmatprep.subr.bf16.mxu1 %v2357_v3  ;;  %s2362_s3 = smov 24   ;;  %s2363_s26 = smov 8   ;;  %vm1856_vm10 = vcmask 259072   ;;  %vm921_vm13 = vcmask 58368   ;;  %vm1900_vm14 = vcmask 7168   ;;  %vm1902_vm15 = vcmask 5120  }
  0x1e   :  { %2062 = vmatpush3.bf16.msra.mxu0 %v2509_v4  ;;  %2065 = vmatprep.mubr.msk.bf16.mxu0 %vm2358_vm0, %v2357_v3 }
  0x1f   :  { %2063 = vmatprep.subr.bf16.mxu0 %v2357_v3  ;;  %2058 = vmatmul.mubr.bf16.vlgmr.msra.gmra.mrb[0].mxu1 %v2360_v14 }
  0x20   :  { %2070 = vmatpush3.bf16.msra.mxu1 %v2509_v4  ;;  %2073 = vmatprep.mubr.msk.bf16.mxu1 %vm2358_vm0, %v2357_v3  ;;  %v1942_v18 = vld [vmem:[%s3007_s4] ss:$0 sm:$0xff] }
  0x21   :  { %2071 = vmatprep.subr.bf16.mxu1 %v2357_v3 }
  0x22   :  { %2064 = vmatpush3.bf16.msra.mxu0 %v2535_v12 }
  0x23   :  { %2077 = vmatprep.subr.bf16.mxu0 %v2357_v3 }
  0x24   :  { %2072 = vmatpush3.bf16.msra.mxu1 %v2535_v12 }
  0x25   :  { %2085 = vmatprep.subr.bf16.mxu1 %v2357_v3 }
  0x8b   :  { %v2555_v16 = vpop.permute.xlu0 %203 }
  0xf0   :  { %v133_v15 = vpop.f32.mrb[0].mxu0 }
  0xf1   :  { %v2051_v17 = vpop.f32.mrb[1].mxu0  ;;  %v2564_v27 = vadd.f32 %v1942_v18, %v133_v15 }
  0xf2   :  { %v136_v19 = vpop.f32.mrb[2].mxu0  ;;  %v185_v20 = vpop.f32.mrb[0].mxu1 }
  0xf3   :  { %v2560_v21 = vadd.f32 %v1942_v18, %v136_v19  ;;  %v2052_v22 = vpop.f32.mrb[3].mxu0  ;;  %v206_v23 = vadd.f32 %v2555_v16, %v185_v20  ;;  %v2059_v24 = vpop.f32.mrb[1].mxu1  ;;  %v191_v28 = vadd.f32 %v185_v20, %v2564_v27 }
  0xf4   :  { %v188_v25 = vpop.f32.mrb[2].mxu1 }
  0xf5   :  { %208 = vrot.lane.b32.xlu0 %v206_v23, %s2359_s6  ;;  %v2060_v26 = vpop.f32.mrb[3].mxu1  ;;  %v1944_v29 = vmul.f32 -1.442695, %v191_v28 }
  0xf7   :  { %2227 = vpow2.f32 %v1944_v29 }
 0x101   :  { %v2228_v30 = vpop.eup %2227 }
 0x102   :  { %v195_v31 = vadd.f32 1.0, %v2228_v30 }
 0x104   :  { %2229 = vrcp.f32 %v195_v31 }
 0x10e   :  { %v2230_v32 = vpop.eup %2229 }
 0x10f   :  { %v218_v38 = vsub.f32 1.0, %v2230_v32  ;;  %v224_v40 = vmul.f32 0.0, %v2230_v32 }
 0x167   :  { %v209_v33 = vpop.permute.xlu0 %208 }
 0x168   :  { %v211_v34 = vmul.f32 %v2230_v32, %v209_v33 }
 0x16a   :  { %213 = vrot.lane.b32.xlu1 %v211_v34, %s2359_s6 }
 0x1dc   :  { %v214_v35 = vpop.permute.xlu1 %213 }
 0x1dd   :  { %v216_v36 = vadd.f32 %v214_v35, %v2564_v27 }
 0x1df   :  { %2231 = vtanh.f32 %v216_v36 }
 0x1e9   :  { %v2232_v37 = vpop.eup %2231 }
 0x1ea   :  { %220 = vrot.lane.b32.xlu1 %v2232_v37, %s2361_s28 }
 0x25c   :  { %v221_v39 = vpop.permute.xlu1 %220 }
 0x25d   :  { %v223_v41 = vmul.f32 %v221_v39, %v218_v38 }
 0x25f   :  { %v225_v42 = vadd.f32 %v224_v40, %v223_v41 }
 0x261   :  { %v226_v43 = vpack.c.bf16 %v225_v42, %v225_v42  ;;  %v303_v62 = vrot.slane %v225_v42, 6 }
 0x263   :  { %228 = vrot.lane.b32.xlu0 %v226_v43, %s2361_s28 }
 0x2d5   :  { %v229_v44 = vpop.permute.xlu0 %228 }
 0x2d6   :  { %2066 = vmatmul.mubr.msk.bf16.vlgmr.msra.gmra.mrb[4].mxu0 %vm147_vm2, %v229_v44 }
 0x2d7   :  { %2078 = vmatpush3.bf16.msra.mxu0 %v2509_v4  ;;  %2081 = vmatprep.mubr.msk.bf16.mxu0 %vm2358_vm0, %v2357_v3 }
 0x2d8   :  { %2079 = vmatprep.subr.bf16.mxu0 %v2357_v3 }
 0x2db   :  { %2080 = vmatpush3.bf16.msra.mxu0 %v2535_v12 }
 0x2dc   :  { %2093 = vmatprep.subr.bf16.mxu0 %v2357_v3 }
 0x3a9   :  { %v267_v45 = vpop.f32.mrb[4].mxu0 }
 0x3aa   :  { %v283_v46 = vadd.f32 %v267_v45, %v2555_v16  ;;  %v2067_v47 = vpop.f32.mrb[5].mxu0  ;;  %v274_v51 = vrot.slane %v267_v45, 6 }
 0x3ab   :  { %v270_v48 = vpop.f32.mrb[6].mxu0 }
 0x3ac   :  { %v285_v49 = vrot.slane %v283_v46, 6  ;;  %v2068_v50 = vpop.f32.mrb[7].mxu0  ;;  %v276_v52 = vadd.f32 %v274_v51, %v2564_v27 }
 0x3ae   :  { %286 = vrot.lane.b32.xlu1 %v285_v49, %s2359_s6  ;;  %v1947_v53 = vmul.f32 -1.442695, %v276_v52 }
 0x3b0   :  { %2233 = vpow2.f32 %v1947_v53 }
 0x3ba   :  { %v2234_v54 = vpop.eup %2233 }
 0x3bb   :  { %v280_v55 = vadd.f32 1.0, %v2234_v54 }
 0x3bd   :  { %2235 = vrcp.f32 %v280_v55 }
 0x3c7   :  { %v2236_v56 = vpop.eup %2235 }
 0x3c8   :  { %v296_v63 = vsub.f32 1.0, %v2236_v56  ;;  %v305_v1 = vmul.f32 %v2236_v56, %v303_v62 }
 0x420   :  { %v287_v57 = vpop.permute.xlu1 %286 }
 0x421   :  { %v289_v58 = vmul.f32 %v2236_v56, %v287_v57 }
 0x423   :  { %291 = vrot.lane.b32.xlu0 %v289_v58, %s2359_s6 }
 0x495   :  { %v292_v59 = vpop.permute.xlu0 %291 }
 0x496   :  { %v294_v60 = vadd.f32 %v292_v59, %v2564_v27 }
 0x498   :  { %2237 = vtanh.f32 %v294_v60 }
 0x4a2   :  { %v2238_v61 = vpop.eup %2237 }
 0x4a3   :  { %298 = vrot.lane.b32.xlu1 %v2238_v61, %s2361_s28 }
 0x515   :  { %v299_v0 = vpop.permute.xlu1 %298 }
 0x516   :  { %v301_v2 = vmul.f32 %v299_v0, %v296_v63 }
 0x518   :  { %v306_v5 = vadd.f32 %v305_v1, %v301_v2 }
 0x51a   :  { %v307_v6 = vpack.c.bf16 %v306_v5, %v306_v5  ;;  %v385_v30 = vrot.slane %v306_v5, 6 }
 0x51c   :  { %v309_v7 = vrot.slane %v307_v6, 1 }
 0x51e   :  { %310 = vrot.lane.b32.xlu0 %v309_v7, %s2361_s28 }
 0x590   :  { %v311_v8 = vpop.permute.xlu0 %310 }
 0x591   :  { %2074 = vmatmul.mubr.msk.bf16.vlgmr.msra.gmra.mrb[4].mxu1 %vm147_vm2, %v311_v8 }
 0x592   :  { %2086 = vmatpush3.bf16.msra.mxu1 %v2509_v4  ;;  %2089 = vmatprep.mubr.msk.bf16.mxu1 %vm2358_vm0, %v2357_v3 }
 0x593   :  { %2087 = vmatprep.subr.bf16.mxu1 %v2357_v3 }
 0x596   :  { %2088 = vmatpush3.bf16.msra.mxu1 %v2535_v12 }
 0x597   :  { %2101 = vmatprep.subr.bf16.mxu1 %v2357_v3 }
 0x664   :  { %v349_v9 = vpop.f32.mrb[4].mxu1 }
 0x665   :  { %v365_v10 = vadd.f32 %v349_v9, %v2555_v16  ;;  %v2075_v11 = vpop.f32.mrb[5].mxu1  ;;  %v356_v17 = vrot.slane %v349_v9, 4 }
 0x666   :  { %v352_v13 = vpop.f32.mrb[6].mxu1 }
 0x667   :  { %v367_v14 = vrot.slane %v365_v10, 4  ;;  %v2076_v15 = vpop.f32.mrb[7].mxu1  ;;  %v358_v18 = vadd.f32 %v356_v17, %v2564_v27 }
 0x669   :  { %368 = vrot.lane.b32.xlu1 %v367_v14, %s2359_s6  ;;  %v1949_v19 = vmul.f32 -1.442695, %v358_v18 }
 0x66b   :  { %2239 = vpow2.f32 %v1949_v19 }
 0x675   :  { %v2240_v20 = vpop.eup %2239 }
 0x676   :  { %v362_v22 = vadd.f32 1.0, %v2240_v20 }
 0x678   :  { %2241 = vrcp.f32 %v362_v22 }
 0x682   :  { %v2242_v23 = vpop.eup %2241 }
 0x683   :  { %v378_v31 = vsub.f32 1.0, %v2242_v23  ;;  %v387_v33 = vmul.f32 %v2242_v23, %v385_v30 }
 0x6db   :  { %v369_v24 = vpop.permute.xlu1 %368 }
 0x6dc   :  { %v371_v25 = vmul.f32 %v2242_v23, %v369_v24 }
 0x6de   :  { %373 = vrot.lane.b32.xlu0 %v371_v25, %s2359_s6 }
 0x750   :  { %v374_v26 = vpop.permute.xlu0 %373 }
 0x751   :  { %v376_v28 = vadd.f32 %v374_v26, %v2564_v27 }
 0x753   :  { %2243 = vtanh.f32 %v376_v28 }
 0x75d   :  { %v2244_v29 = vpop.eup %2243 }
 0x75e   :  { %380 = vrot.lane.b32.xlu1 %v2244_v29, %s2361_s28 }
 0x7d0   :  { %v381_v32 = vpop.permute.xlu1 %380 }
 0x7d1   :  { %v383_v34 = vmul.f32 %v381_v32, %v378_v31 }
 0x7d3   :  { %v388_v35 = vadd.f32 %v387_v33, %v383_v34 }
 0x7d5   :  { %v389_v36 = vpack.c.bf16 %v388_v35, %v388_v35  ;;  %v467_v56 = vrot.slane %v388_v35, 6 }
 0x7d7   :  { %v391_v37 = vrot.slane %v389_v36, 2 }
 0x7d9   :  { %392 = vrot.lane.b32.xlu0 %v391_v37, %s2361_s28 }
 0x84b   :  { %v393_v38 = vpop.permute.xlu0 %392 }
 0x84c   :  { %2082 = vmatmul.mubr.msk.bf16.vlgmr.msra.gmra.mrb[8].mxu0 %vm147_vm2, %v393_v38 }
 0x84d   :  { %2094 = vmatpush3.bf16.msra.mxu0 %v2509_v4  ;;  %2097 = vmatprep.mubr.msk.bf16.mxu0 %vm2358_vm0, %v2357_v3 }
 0x84e   :  { %2095 = vmatprep.subr.bf16.mxu0 %v2357_v3 }
 0x851   :  { %2096 = vmatpush3.bf16.msra.mxu0 %v2535_v12 }
 0x852   :  { %2109 = vmatprep.subr.bf16.mxu0 %v2357_v3 }
 0x91f   :  { %v431_v39 = vpop.f32.mrb[8].mxu0 }
 0x920   :  { %v447_v40 = vadd.f32 %v431_v39, %v2555_v16  ;;  %v2083_v41 = vpop.f32.mrb[9].mxu0  ;;  %v438_v45 = vrot.slane %v431_v39, 2 }
 0x921   :  { %v434_v42 = vpop.f32.mrb[10].mxu0 }
 0x922   :  { %v449_v43 = vrot.slane %v447_v40, 2  ;;  %v2084_v44 = vpop.f32.mrb[11].mxu0  ;;  %v440_v46 = vadd.f32 %v438_v45, %v2564_v27 }
 0x924   :  { %450 = vrot.lane.b32.xlu1 %v449_v43, %s2359_s6  ;;  %v1951_v47 = vmul.f32 -1.442695, %v440_v46 }
 0x926   :  { %2245 = vpow2.f32 %v1951_v47 }
 0x930   :  { %v2246_v48 = vpop.eup %2245 }
 0x931   :  { %v444_v49 = vadd.f32 1.0, %v2246_v48 }
 0x933   :  { %2247 = vrcp.f32 %v444_v49 }
 0x93d   :  { %v2248_v50 = vpop.eup %2247 }
 0x93e   :  { %v460_v57 = vsub.f32 1.0, %v2248_v50  ;;  %v469_v59 = vmul.f32 %v2248_v50, %v467_v56 }
 0x996   :  { %v451_v51 = vpop.permute.xlu1 %450 }
 0x997   :  { %v453_v52 = vmul.f32 %v2248_v50, %v451_v51 }
 0x999   :  { %455 = vrot.lane.b32.xlu0 %v453_v52, %s2359_s6 }
 0xa0b   :  { %v456_v53 = vpop.permute.xlu0 %455 }
 0xa0c   :  { %v458_v54 = vadd.f32 %v456_v53, %v2564_v27 }
 0xa0e   :  { %2249 = vtanh.f32 %v458_v54 }
 0xa18   :  { %v2250_v55 = vpop.eup %2249 }
 0xa19   :  { %462 = vrot.lane.b32.xlu1 %v2250_v55, %s2361_s28 }
 0xa8b   :  { %v463_v58 = vpop.permute.xlu1 %462 }
 0xa8c   :  { %v465_v60 = vmul.f32 %v463_v58, %v460_v57 }
 0xa8e   :  { %v470_v61 = vadd.f32 %v469_v59, %v465_v60 }
 0xa90   :  { %v471_v62 = vpack.c.bf16 %v470_v61, %v470_v61  ;;  %v545_v19 = vrot.slane %v470_v61, 6 }
 0xa92   :  { %v473_v63 = vrot.slane %v471_v62, 3 }
 0xa94   :  { %474 = vrot.lane.b32.xlu0 %v473_v63, %s2361_s28 }
 0xb06   :  { %v475_v0 = vpop.permute.xlu0 %474 }
 0xb07   :  { %2090 = vmatmul.mubr.msk.bf16.vlgmr.msra.gmra.mrb[8].mxu1 %vm147_vm2, %v475_v0 }
 0xb08   :  { %2102 = vmatpush3.bf16.msra.mxu1 %v2509_v4  ;;  %2105 = vmatprep.mubr.msk.bf16.mxu1 %vm2358_vm0, %v2357_v3 }
 0xb09   :  { %2103 = vmatprep.subr.bf16.mxu1 %v2357_v3 }
 0xb0c   :  { %2104 = vmatpush3.bf16.msra.mxu1 %v2535_v12 }
 0xb0d   :  { %2117 = vmatprep.subr.bf16.mxu1 %v2357_v3 }
 0xbda   :  { %v513_v27 = vpop.f32.mrb[8].mxu1 }
 0xbdb   :  { %v526_v1 = vadd.f32 %v513_v27, %v2555_v16  ;;  %v2091_v2 = vpop.f32.mrb[9].mxu1  ;;  %v519_v7 = vadd.f32 %v513_v27, %v2560_v21 }
 0xbdc   :  { %v516_v5 = vpop.f32.mrb[10].mxu1 }
 0xbdd   :  { %528 = vrot.lane.b32.xlu1 %v526_v1, %s2359_s6  ;;  %v2092_v6 = vpop.f32.mrb[11].mxu1  ;;  %v1953_v8 = vmul.f32 -1.442695, %v519_v7 }
 0xbdf   :  { %2251 = vpow2.f32 %v1953_v8 }
 0xbe9   :  { %v2252_v9 = vpop.eup %2251 }
 0xbea   :  { %v523_v10 = vadd.f32 1.0, %v2252_v9 }
 0xbec   :  { %2253 = vrcp.f32 %v523_v10 }
 0xbf6   :  { %v2254_v11 = vpop.eup %2253 }
 0xbf7   :  { %v538_v20 = vsub.f32 1.0, %v2254_v11  ;;  %v547_v23 = vmul.f32 %v2254_v11, %v545_v19 }
 0xc4f   :  { %v529_v13 = vpop.permute.xlu1 %528 }
 0xc50   :  { %v531_v14 = vmul.f32 %v2254_v11, %v529_v13 }
 0xc52   :  { %533 = vrot.lane.b32.xlu0 %v531_v14, %s2359_s6 }
 0xcc4   :  { %v534_v15 = vpop.permute.xlu0 %533 }
 0xcc5   :  { %v536_v17 = vadd.f32 %v534_v15, %v2560_v21 }
 0xcc7   :  { %2255 = vtanh.f32 %v536_v17 }
 0xcd1   :  { %v2256_v18 = vpop.eup %2255 }
 0xcd2   :  { %540 = vrot.lane.b32.xlu1 %v2256_v18, %s2361_s28 }
 0xd44   :  { %v541_v22 = vpop.permute.xlu1 %540 }
 0xd45   :  { %v543_v24 = vmul.f32 %v541_v22, %v538_v20 }
 0xd47   :  { %v548_v25 = vadd.f32 %v547_v23, %v543_v24 }
 0xd49   :  { %v549_v26 = vpack.c.bf16 %v548_v25, %v548_v25  ;;  %v626_v44 = vrot.slane %v548_v25, 6 }
 0xd4b   :  { %551 = vrot.lane.b32.xlu0 %v549_v26, %s2361_s28 }
 0xdbd   :  { %v552_v28 = vpop.permute.xlu0 %551 }
 0xdbe   :  { %2098 = vmatmul.mubr.msk.bf16.vlgmr.msra.gmra.mrb[12].mxu0 %vm147_vm2, %v552_v28 }
 0xdbf   :  { %2110 = vmatpush3.bf16.msra.mxu0 %v2509_v4  ;;  %2113 = vmatprep.mubr.msk.bf16.mxu0 %vm2358_vm0, %v2357_v3 }
 0xdc0   :  { %2111 = vmatprep.subr.bf16.mxu0 %v2357_v3 }
 0xdc3   :  { %2112 = vmatpush3.bf16.msra.mxu0 %v2535_v12 }
 0xdc4   :  { %2125 = vmatprep.subr.bf16.mxu0 %v2357_v3 }
 0xe91   :  { %v590_v29 = vpop.f32.mrb[12].mxu0 }
 0xe92   :  { %v606_v30 = vadd.f32 %v590_v29, %v2555_v16  ;;  %v2099_v31 = vpop.f32.mrb[13].mxu0  ;;  %v597_v35 = vrot.slane %v590_v29, 6 }
 0xe93   :  { %v593_v32 = vpop.f32.mrb[14].mxu0 }
 0xe94   :  { %v608_v33 = vrot.slane %v606_v30, 6  ;;  %v2100_v34 = vpop.f32.mrb[15].mxu0  ;;  %v599_v4 = vadd.f32 %v597_v35, %v2560_v21  ;;  %v794_v35 = vld [vmem:[%s3008_s0] sm:$0xff] }
 0xe96   :  { %609 = vrot.lane.b32.xlu1 %v608_v33, %s2359_s6  ;;  %v1955_v36 = vmul.f32 -1.442695, %v599_v4  ;;  %v795_v4 = vld [vmem:[%s3008_s0 + $0x8] sm:$0xff] }
 0xe98   :  { %2257 = vpow2.f32 %v1955_v36  ;;  %v855_v36 = vld [vmem:[%s2971_s10] sm:$0xff] }
 0xea2   :  { %v2258_v37 = vpop.eup %2257 }
 0xea3   :  { %v603_v38 = vadd.f32 1.0, %v2258_v37  ;;  %v799_v37 = vpack.c.bf16 %v795_v4, %v794_v35 }
 0xea5   :  { %2259 = vrcp.f32 %v603_v38  ;;  %v856_v38 = vld [vmem:[%s2971_s10 + $0x8] sm:$0xff] }
 0xeaf   :  { %v2260_v12 = vpop.eup %2259 }
 0xeb0   :  { %v619_v45 = vsub.f32 1.0, %v2260_v12  ;;  %v628_v47 = vmul.f32 %v2260_v12, %v626_v44 }
 0xf08   :  { %v610_v39 = vpop.permute.xlu1 %609 }
 0xf09   :  { %v612_v40 = vmul.f32 %v2260_v12, %v610_v39  ;;  %v797_v12 = vld [vmem:[%s3008_s0 + $0x18] sm:$0xff]  ;;  %v859_v39 = vpack.c.bf16 %v856_v38, %v855_v36 }
 0xf0b   :  { %614 = vrot.lane.b32.xlu0 %v612_v40, %s2359_s6  ;;  %v857_v40 = vld [vmem:[%s2971_s10 + $0x10] sm:$0xff] }
 0xf7d   :  { %v615_v41 = vpop.permute.xlu0 %614 }
 0xf7e   :  { %v617_v42 = vadd.f32 %v615_v41, %v2560_v21  ;;  %v858_v41 = vld [vmem:[%s2971_s10 + $0x18] sm:$0xff] }
 0xf7f   :  { %v860_v44 = vpack.c.bf16 %v858_v41, %v857_v40 }
 0xf80   :  { %2261 = vtanh.f32 %v617_v42 }
 0xf8a   :  { %v2262_v43 = vpop.eup %2261 }
 0xf8b   :  { %621 = vrot.lane.b32.xlu1 %v2262_v43, %s2361_s28 }
 0xffd   :  { %v622_v46 = vpop.permute.xlu1 %621 }
 0xffe   :  { %v624_v48 = vmul.f32 %v622_v46, %v619_v45 }
0x1000   :  { %v629_v49 = vadd.f32 %v628_v47, %v624_v48 }
0x1002   :  { %v630_v50 = vpack.c.bf16 %v629_v49, %v629_v49  ;;  %v708_v7 = vrot.slane %v629_v49, 6 }
0x1004   :  { %v632_v51 = vrot.slane %v630_v50, 1 }
0x1006   :  { %633 = vrot.lane.b32.xlu0 %v632_v51, %s2361_s28 }
0x1078   :  { %v634_v52 = vpop.permute.xlu0 %633 }
0x1079   :  { %2106 = vmatmul.mubr.msk.bf16.vlgmr.msra.gmra.mrb[12].mxu1 %vm147_vm2, %v634_v52 }
0x107a   :  { %2121 = vmatprep.mubr.msk.bf16.mxu1 %vm2358_vm0, %v2357_v3  ;;  %2118 = vmatpush3.bf16.msra.mxu1 %v799_v37 }
0x107b   :  { %2119 = vmatprep.subr.bf16.mxu1 %v2357_v3 }
0x114c   :  { %v672_v53 = vpop.f32.mrb[12].mxu1 }
0x114d   :  { %v688_v54 = vadd.f32 %v672_v53, %v2555_v16  ;;  %v2107_v55 = vpop.f32.mrb[13].mxu1  ;;  %v679_v59 = vrot.slane %v672_v53, 4  ;;  %v937_v53 = vld [vmem:[%s2981_s20] sm:$0xff] }
0x114e   :  { %v675_v56 = vpop.f32.mrb[14].mxu1 }
0x114f   :  { %v690_v57 = vrot.slane %v688_v54, 4  ;;  %v2108_v58 = vpop.f32.mrb[15].mxu1  ;;  %v681_v60 = vadd.f32 %v679_v59, %v2560_v21  ;;  %v938_v54 = vld [vmem:[%s2981_s20 + $0x8] sm:$0xff]  ;;  %v939_v56 = vld [vmem:[%s2981_s20 + $0x10] sm:$0xff] }
0x1150   :  { %v944_v55 = vpack.c.bf16 %v938_v54, %v937_v53 }
0x1151   :  { %691 = vrot.lane.b32.xlu1 %v690_v57, %s2359_s6  ;;  %v1957_v61 = vmul.f32 -1.442695, %v681_v60  ;;  %v940_v57 = vld [vmem:[%s2981_s20 + $0x18] sm:$0xff]  ;;  %v941_v60 = vld [vmem:[%s2981_s20 + $0x20] sm:$0xff] }
0x1152   :  { %v945_v59 = vpack.c.bf16 %v940_v57, %v939_v56 }
0x1153   :  { %2263 = vpow2.f32 %v1957_v61  ;;  %v942_v61 = vld [vmem:[%s2981_s20 + $0x28] sm:$0xff] }
0x115d   :  { %v2264_v62 = vpop.eup %2263 }
0x115e   :  { %v685_v63 = vadd.f32 1.0, %v2264_v62  ;;  %v946_v62 = vpack.c.bf16 %v942_v61, %v941_v60  ;;  %v1093_v61 = vld [vmem:[%s2973_s12] sm:$0xff] }
0x1160   :  { %2265 = vrcp.f32 %v685_v63  ;;  %v935_v63 = vld [vmem:[%s2980_s19] sm:$0xff] }
0x116a   :  { %v2266_v0 = vpop.eup %2265 }
0x116b   :  { %v701_v8 = vsub.f32 1.0, %v2266_v0  ;;  %v710_v10 = vmul.f32 %v2266_v0, %v708_v7 }
0x11c3   :  { %v692_v27 = vpop.permute.xlu1 %691 }
0x11c4   :  { %v694_v1 = vmul.f32 %v2266_v0, %v692_v27  ;;  %v936_v0 = vld [vmem:[%s2980_s19 + $0x8] sm:$0xf] }
0x11c5   :  { %v943_v27 = vpack.c.bf16 %v936_v0, %v935_v63  ;;  %v1091_v63 = vld [vmem:[%s3011_s5] sm:$0xff] }
0x11c6   :  { %696 = vrot.lane.b32.xlu0 %v694_v1, %s2359_s6  ;;  %v1016_v1 = vld [vmem:[%s2983_s22] sm:$0xff]  ;;  %s2333_s22 = scalar_lea.hbm %s2985_s24, 16 }
0x11c7   :  { %p2334_p0 = scmp.ne.s32.totalorder %s2985_s24, %s2333_s22  ;;  %p2337_p1 = scmp.lt.u32.totalorder %s2333_s22, %s2985_s24 }
0x11c9   :  { %p2339_p2 = pnand %p2337_p1, %p2334_p0 }
0x1238   :  { %v697_v2 = vpop.permute.xlu0 %696 }
0x1239   :  { %v699_v5 = vadd.f32 %v697_v2, %v2560_v21  ;;  %v1018_v2 = vpack.c.bf16 %v1016_v1, %v1016_v1  ;;  %v1200_v1 = vld [vmem:[%s2975_s14] sm:$0xff] }
0x123b   :  { %2267 = vtanh.f32 %v699_v5  ;;  %v1032_v5 = vsel %vm1030_vm4, %v1018_v2, 0  ;;  %v1201_v2 = vld [vmem:[%s2975_s14 + $0x8] sm:$0xf] }
0x1245   :  { %v2268_v6 = vpop.eup %2267 }
0x1246   :  { %703 = vrot.lane.b32.xlu1 %v2268_v6, %s2361_s28  ;;  %v1962_v6 = vld [vmem:[%s2972_s11] ss:$0 sm:$0xff] }
0x12b8   :  { %v704_v9 = vpop.permute.xlu1 %703 }
0x12b9   :  { %v706_v11 = vmul.f32 %v704_v9, %v701_v8 }
0x12bb   :  { %v711_v13 = vadd.f32 %v710_v10, %v706_v11 }
0x12bd   :  { %v712_v14 = vpack.c.bf16 %v711_v13, %v711_v13  ;;  %v790_v45 = vrot.slane %v711_v13, 6 }
0x12bf   :  { %v714_v15 = vrot.slane %v712_v14, 2 }
0x12c1   :  { %715 = vrot.lane.b32.xlu0 %v714_v15, %s2361_s28 }
0x1333   :  { %v716_v17 = vpop.permute.xlu0 %715 }
0x1334   :  { %2114 = vmatmul.mubr.msk.bf16.vlgmr.msra.gmra.mrb[16].mxu0 %vm147_vm2, %v716_v17 }
0x1335   :  { %2129 = vmatprep.mubr.msk.bf16.mxu0 %vm2358_vm0, %v2357_v3  ;;  %2126 = vmatpush3.bf16.msra.mxu0 %v859_v39 }
0x1336   :  { %2127 = vmatprep.subr.bf16.mxu0 %v2357_v3 }
0x1339   :  { %2128 = vmatpush3.bf16.msra.mxu0 %v860_v44 }
0x133a   :  { %2143 = vmatprep.subr.bf16.mxu0 %v2357_v3 }
0x1407   :  { %v754_v18 = vpop.f32.mrb[16].mxu0 }
0x1408   :  { %v770_v19 = vadd.f32 %v754_v18, %v2555_v16  ;;  %v2115_v20 = vpop.f32.mrb[17].mxu0  ;;  %v761_v25 = vrot.slane %v754_v18, 2 }
0x1409   :  { %v757_v22 = vpop.f32.mrb[18].mxu0 }
0x140a   :  { %v772_v23 = vrot.slane %v770_v19, 2  ;;  %v2116_v24 = vpop.f32.mrb[19].mxu0  ;;  %v763_v26 = vadd.f32 %v761_v25, %v2560_v21  ;;  %v1960_v22 = vld [vmem:[%s3009_s30] ss:$0 sm:$0xff] }
0x140b   :  { %v1965_v24 = vld [vmem:[%s2982_s21] ss:$0 sm:$0xff]  ;;  %s2366_s21 = smov 116  }
0x140c   :  { %773 = vrot.lane.b32.xlu1 %v772_v23, %s2359_s6  ;;  %v1959_v28 = vmul.f32 -1.442695, %v763_v26 }
0x140e   :  { %2269 = vpow2.f32 %v1959_v28 }
0x1418   :  { %v2270_v29 = vpop.eup %2269 }
0x1419   :  { %v767_v30 = vadd.f32 1.0, %v2270_v29 }
0x141b   :  { %2271 = vrcp.f32 %v767_v30 }
0x1425   :  { %v2272_v31 = vpop.eup %2271 }
0x1426   :  { %v783_v46 = vsub.f32 1.0, %v2272_v31  ;;  %v792_v48 = vmul.f32 %v2272_v31, %v790_v45 }
0x147e   :  { %v774_v32 = vpop.permute.xlu1 %773 }
0x147f   :  { %v776_v33 = vmul.f32 %v2272_v31, %v774_v32 }
0x1481   :  { %778 = vrot.lane.b32.xlu0 %v776_v33, %s2359_s6 }
0x14f3   :  { %v779_v16 = vpop.permute.xlu0 %778 }
0x14f4   :  { %v781_v34 = vadd.f32 %v779_v16, %v2560_v21  ;;  %v796_v21 = vld [vmem:[%s3008_s0 + $0x10] sm:$0xff]  ;;  %v911_v16 = vld [vmem:[%s3010_s1] sm:$0x3]  ;;  %s2364_s1 = smov 104  }
0x14f5   :  { %v800_v42 = vpack.c.bf16 %v797_v12, %v796_v21 }
0x14f6   :  { %2273 = vtanh.f32 %v781_v34 }
0x14f7   :  { %2120 = vmatpush3.bf16.msra.mxu1 %v800_v42 }
0x14f8   :  { %2133 = vmatprep.subr.bf16.mxu1 %v2357_v3 }
0x1500   :  { %v2274_v43 = vpop.eup %2273 }
0x1501   :  { %785 = vrot.lane.b32.xlu1 %v2274_v43, %s2361_s28 }
0x1573   :  { %v786_v47 = vpop.permute.xlu1 %785 }
0x1574   :  { %v788_v49 = vmul.f32 %v786_v47, %v783_v46 }
0x1576   :  { %v793_v50 = vadd.f32 %v792_v48, %v788_v49  ;;  %v1967_v49 = vld [vmem:[%s2984_s23] ss:$0 sm:$0xff] }
0x1578   :  { %v798_v51 = vpack.c.bf16 %v793_v50, %v793_v50 }
0x157a   :  { %v809_v52 = vrot.slane %v798_v51, 3 }
0x157c   :  { %810 = vrot.lane.b32.xlu0 %v809_v52, %s2361_s28 }
0x15ee   :  { %v811_v58 = vpop.permute.xlu0 %810 }
0x15ef   :  { %2122 = vmatmul.mubr.msk.bf16.vlgmr.msra.gmra.mrb[16].mxu1 %vm147_vm2, %v811_v58  ;;  %2130 = vmatmul.mubr.msk.bf16.vlgmr.msra.gmra.mrb[20].mxu0 %vm147_vm2, %v811_v58 }
0x15f0   :  { %2134 = vmatpush3.bf16.msra.mxu1 %v944_v55  ;;  %2139 = vmatprep.mubr.msk.bf16.mxu1 %vm2358_vm0, %v2357_v3 }
0x15f1   :  { %2135 = vmatprep.subr.bf16.mxu1 %v2357_v3  ;;  %2145 = vmatprep.mubr.msk.bf16.mxu0 %vm2358_vm0, %v2357_v3 }
0x15f2   :  { %2144 = vmatpush3.bf16.msra.mxu0 %v1032_v5 }
0x15f3   :  { %2149 = vmatprep.subr.bf16.mxu0 %v2357_v3 }
0x15f4   :  { %2136 = vmatpush3.bf16.msra.mxu1 %v945_v59 }
0x15f5   :  { %2137 = vmatprep.subr.bf16.mxu1 %v2357_v3 }
0x15f8   :  { %2138 = vmatpush3.bf16.msra.mxu1 %v946_v62  ;;  %v1094_v62 = vld [vmem:[%s2973_s12 + $0x8] sm:$0xff] }
0x15f9   :  { %2155 = vmatprep.subr.bf16.mxu1 %v2357_v3  ;;  %v1096_v0 = vpack.c.bf16 %v1094_v62, %v1093_v61 }
0x15fb   :  { %2140 = vmatmul.mubr.msk.bf16.vlgmr.msra.gmra.mrb[20].mxu1 %vm954_vm3, %v943_v27  ;;  %v1092_v27 = vld [vmem:[%s3011_s5 + $0x8] sm:$0x3f]  ;;  %s3012_s5 = sld [smem:[#allocation11_spill]] }
0x15fc   :  { %2157 = vmatprep.mubr.msk.bf16.mxu1 %vm2358_vm0, %v2357_v3  ;;  %v1095_v5 = vpack.c.bf16 %v1092_v27, %v1091_v63 }
0x16c2   :  { %v849_v7 = vpop.f32.mrb[16].mxu1  ;;  %v902_v8 = vpop.f32.mrb[20].mxu0 }
0x16c3   :  { %v2732_v9 = vadd.f32 %v1962_v6, %v902_v8  ;;  %v2123_v10 = vpop.f32.mrb[17].mxu1  ;;  %v2131_v11 = vpop.f32.mrb[21].mxu0  ;;  %v850_v23 = vadd.f32 %v1960_v22, %v849_v7  ;;  %v1202_v6 = vpack.c.bf16 %v1201_v2, %v1200_v1  ;;  %v1141_v8 = vld [vmem:[%s2974_s13] sm:$0xff] }
0x16c4   :  { %v852_v13 = vpop.f32.mrb[18].mxu1  ;;  %v905_v14 = vpop.f32.mrb[22].mxu0  ;;  %v1142_v10 = vld [vmem:[%s2974_s13 + $0x8] sm:$0xf] }
0x16c5   :  { %v908_v15 = vmul.f32 0.5, %v2732_v9  ;;  %v914_v17 = vmul.f32 1.442695, %v2732_v9  ;;  %v2124_v18 = vpop.f32.mrb[19].mxu1  ;;  %v2132_v19 = vpop.f32.mrb[23].mxu0  ;;  %v916_v29 = vmul.f32 %v850_v23, %v850_v23  ;;  %v2777_v7 = vsel %vm1156_vm7, %v1202_v6, 0 }
0x16c6   :  { %v1144_v11 = vpack.c.bf16 %v1142_v10, %v1141_v8 }
0x16c7   :  { %v909_v20 = vmul.f32 1.442695, %v908_v15  ;;  %2275 = vpow2.f32 %v914_v17  ;;  %v1974_v15 = vld [vmem:[%s2977_s16] ss:$0 sm:$0xff] }
0x16c8   :  { %v1158_v14 = vsel %vm1156_vm7, %v1144_v11, 0 }
0x16c9   :  { %2277 = vpow2.f32 %v909_v20  ;;  %2156 = vmatpush3.bf16.msra.mxu1 %v1158_v14 }
0x16ca   :  { %2167 = vmatprep.subr.bf16.mxu1 %v2357_v3 }
0x16ce   :  { %v992_v25 = vpop.f32.mrb[20].mxu1 }
0x16cf   :  { %v993_v26 = vadd.f32 %v1965_v24, %v992_v25  ;;  %v2141_v28 = vpop.f32.mrb[21].mxu1 }
0x16d0   :  { %v995_v30 = vpop.f32.mrb[22].mxu1  ;;  %v1970_v28 = vld [vmem:[%s2976_s15] ss:$0 sm:$0xff]  ;;  %s2365_s15 = smov 12  }
0x16d1   :  { %v2276_v31 = vpop.eup %2275  ;;  %v999_v32 = vmax.f32 %v993_v26, 0.0  ;;  %v2142_v33 = vpop.f32.mrb[23].mxu1  ;;  %v996_v36 = vadd.f32 %v1965_v24, %v995_v30 }
0x16d2   :  { %v917_v34 = vadd.f32 %v2276_v31, %v916_v29 }
0x16d3   :  { %v2278_v35 = vpop.eup %2277  ;;  %v1002_v4 = vrot.slane %v999_v32, 2  ;;  %v1005_v12 = vrot.slane %v999_v32, 4  ;;  %v1000_v41 = vmax.f32 %v996_v36, 0.0  ;;  %v1008_v43 = vrot.slane %v999_v32, 6 }
0x16d4   :  { %v912_v37 = vmul.f32 %v2278_v35, %v911_v16  ;;  %v2745_v38 = vadd.f32 -1.0, %v917_v34 }
0x16d5   :  { %v1004_v21 = vmax.f32 %v999_v32, %v1002_v4  ;;  %v1013_v46 = vrot.slane %v1000_v41, 2 }
0x16d6   :  { %v2747_v39 = vadd.f32 %v912_v37, %v850_v23  ;;  %v919_v40 = vsub.f32 %v2745_v38, %v2732_v9 }
0x16d7   :  { %v1007_v42 = vmax.f32 %v1004_v21, %v1005_v12 }
0x16d9   :  { %v1010_v44 = vmax.f32 %v1007_v42, %v1008_v43 }
0x16db   :  { %v1011_v45 = vmax.f32 %v1010_v44, %v1000_v41 }
0x16dd   :  { %v1015_v47 = vmax.f32 %v1011_v45, %v1013_v46 }
0x16df   :  { %v1017_v48 = vpack.c.bf16 %v1015_v47, %v1015_v47 }
0x16e1   :  { %2146 = vmatmul.mubr.msk.bf16.vlgmr.msra.gmra.mrb[24].mxu0 %vm1026_vm5, %v1017_v48 }
0x16e2   :  { %2151 = vmatprep.mubr.msk.bf16.mxu0 %vm2358_vm0, %v2357_v3  ;;  %2150 = vmatpush3.bf16.msra.mxu0 %v1096_v0 }
0x16e3   :  { %2161 = vmatprep.subr.bf16.mxu0 %v2357_v3 }
0x16e9   :  { %2152 = vmatmul.mubr.msk.bf16.vlgmr.msra.gmra.mrb[28].mxu0 %vm95_vm1, %v1095_v5 }
0x16ea   :  { %2162 = vmatpush3.bf16.msra.mxu0 %v2777_v7  ;;  %2163 = vmatprep.mubr.msk.bf16.mxu0 %vm2358_vm0, %v2357_v3 }
0x16eb   :  { %2173 = vmatprep.subr.bf16.mxu0 %v2357_v3 }
0x17b4   :  { %v1068_v50 = vpop.f32.mrb[24].mxu0 }
0x17b5   :  { %v1069_v51 = vadd.f32 %v1967_v49, %v1068_v50  ;;  %v2147_v52 = vpop.f32.mrb[25].mxu0 }
0x17b6   :  { %v1071_v53 = vpop.f32.mrb[26].mxu0 }
0x17b7   :  { %v2148_v54 = vpop.f32.mrb[27].mxu0  ;;  %v1075_v55 = vsel %vm1074_vm6, %v1069_v51, -inf }
0x17b8   :  { %1076 = vmax.xlane.f32.xlu1 %v1075_v55 }
0x17bc   :  { %v1134_v19 = vpop.f32.mrb[28].mxu0 }
0x17bd   :  { %v2153_v20 = vpop.f32.mrb[29].mxu0 }
0x17be   :  { %v1137_v22 = vpop.f32.mrb[30].mxu0 }
0x17bf   :  { %v2154_v23 = vpop.f32.mrb[31].mxu0 }
0x17c9   :  { %1260 = vrot.lane.b32.xlu1 %v1974_v15, %s2362_s3 }
0x1845   :  { %v1077_v56 = vpop.xlane.xlu1 %1076 }
0x1846   :  { %v1078_v57 = vsub.f32 %v1069_v51, %v1077_v56 }
0x1848   :  { %v1079_v58 = vmul.f32 1.442695, %v1078_v57 }
0x1849   :  { %v2811_v29 = vpop.permute.xlu1 %1260 }
0x184a   :  { %2279 = vpow2.f32 %v1079_v58 }
0x1854   :  { %v2280_v59 = vpop.eup %2279 }
0x1855   :  { %v1081_v60 = vsel %vm1074_vm6, %v2280_v59, 0.0 }
0x1856   :  { %1082 = vadd.xlane.f32.xlu0 %v1081_v60 }
0x18e3   :  { %v1083_v13 = vpop.xlane.xlu0 %1082 }
0x18e4   :  { %2281 = vrcp.f32 %v1083_v13 }
0x18ee   :  { %v2282_v17 = vpop.eup %2281 }
0x18ef   :  { %v1085_v18 = vmul.f32 %v2282_v17, %v2280_v59 }
0x18f1   :  { %1087 = vrot.lane.b32.xlu0 %v1085_v18, %s2363_s26 }
0x1963   :  { %v1088_v24 = vpop.permute.xlu0 %1087 }
0x1964   :  { %v1090_v25 = vsel %vm1026_vm5, %v2747_v39, %v1088_v24 }
0x1965   :  { %v1143_v26 = vpack.c.bf16 %v1090_v25, %v1090_v25 }
0x1967   :  { %2158 = vmatmul.mubr.msk.bf16.vlgmr.msra.gmra.mrb[24].mxu1 %vm1152_vm8, %v1143_v26  ;;  %2164 = vmatmul.mubr.msk.bf16.vlgmr.msra.gmra.mrb[32].mxu0 %vm1152_vm8, %v1143_v26 }
0x1968   :  { %2168 = vmatpush3.bf16.msra.mxu1 %v2777_v7  ;;  %2169 = vmatprep.mubr.msk.bf16.mxu1 %vm2358_vm0, %v2357_v3 }
0x1969   :  { %2174 = vmatpush3.bf16.msra.mxu0 %v2777_v7  ;;  %2175 = vmatprep.mubr.msk.bf16.mxu0 %vm2358_vm0, %v2357_v3 }
0x196a   :  { %2179 = vmatprep.subr.bf16.mxu1 %v2357_v3  ;;  %2185 = vmatprep.subr.bf16.mxu0 %v2357_v3 }
0x1a3a   :  { %v1194_v30 = vpop.f32.mrb[24].mxu1  ;;  %v1242_v31 = vpop.f32.mrb[32].mxu0 }
0x1a3b   :  { %v1195_v32 = vadd.f32 %v1970_v28, %v1194_v30  ;;  %v1263_v33 = vadd.f32 %v2811_v29, %v1242_v31  ;;  %v2159_v16 = vpop.f32.mrb[25].mxu1  ;;  %v2165_v34 = vpop.f32.mrb[33].mxu0 }
0x1a3c   :  { %v1197_v35 = vpop.f32.mrb[26].mxu1  ;;  %v1245_v4 = vpop.f32.mrb[34].mxu0 }
0x1a3d   :  { %v1204_v36 = vadd.f32 %v1195_v32, %v1134_v19  ;;  %v2160_v37 = vpop.f32.mrb[27].mxu1  ;;  %1265 = vrot.lane.b32.xlu1 %v1263_v33, %s2364_s1  ;;  %v2166_v21 = vpop.f32.mrb[35].mxu0  ;;  %v1288_v12 = vrot.slane %v1195_v32, 6  ;;  %v1372_v39 = vrot.slane %v1195_v32, 4  ;;  %v1457_v41 = vrot.slane %v1195_v32, 2 }
0x1a3e   :  { %v2815_v42 = vadd.f32 %v1195_v32, %v1137_v22 }
0x1a3f   :  { %v1290_v43 = vadd.f32 %v1288_v12, %v1134_v19  ;;  %v2817_v44 = vadd.f32 %v1372_v39, %v1134_v19  ;;  %v2819_v45 = vadd.f32 %v1457_v41, %v1134_v19  ;;  %v2821_v46 = vadd.f32 %v1288_v12, %v1137_v22 }
0x1a40   :  { %v2823_v47 = vadd.f32 %v1372_v39, %v1137_v22  ;;  %v1248_v48 = vadd.f32 %v1242_v31, %v1204_v36 }
0x1a42   :  { %v1973_v49 = vmul.f32 -1.442695, %v1248_v48 }
0x1a44   :  { %2283 = vpow2.f32 %v1973_v49 }
0x1a4e   :  { %v2284_v50 = vpop.eup %2283 }
0x1a4f   :  { %v1252_v51 = vadd.f32 1.0, %v2284_v50 }
0x1a51   :  { %2285 = vrcp.f32 %v1252_v51 }
0x1a5b   :  { %v2286_v52 = vpop.eup %2285 }
0x1a5c   :  { %v1275_v59 = vsub.f32 1.0, %v2286_v52 }
0x1aaf   :  { %v1266_v53 = vpop.permute.xlu1 %1265 }
0x1ab0   :  { %v1268_v54 = vmul.f32 %v2286_v52, %v1266_v53 }
0x1ab2   :  { %1270 = vrot.lane.b32.xlu0 %v1268_v54, %s2362_s3 }
0x1ab6   :  { %1282 = vrot.lane.b32.xlu0 %v1090_v25, %s2365_s15 }
0x1b24   :  { %v1271_v55 = vpop.permute.xlu0 %1270 }
0x1b25   :  { %v1273_v56 = vadd.f32 %v1271_v55, %v1204_v36 }
0x1b27   :  { %2287 = vtanh.f32 %v1273_v56 }
0x1b28   :  { %v1283_v58 = vpop.permute.xlu0 %1282 }
0x1b29   :  { %v1285_v61 = vmul.f32 %v2286_v52, %v1283_v58 }
0x1b31   :  { %v2288_v57 = vpop.eup %2287 }
0x1b32   :  { %1277 = vrot.lane.b32.xlu1 %v2288_v57, %s2366_s21 }
0x1ba4   :  { %v1278_v60 = vpop.permute.xlu1 %1277 }
0x1ba5   :  { %v1280_v62 = vmul.f32 %v1278_v60, %v1275_v59 }
0x1ba7   :  { %v2827_v63 = vadd.f32 %v1285_v61, %v1280_v62 }
0x1ba9   :  { %v1291_v0 = vpack.c.bf16 %v2827_v63, %v2827_v63  ;;  %v1368_v26 = vrot.slane %v2827_v63, 6 }
0x1bab   :  { %1293 = vrot.lane.b32.xlu1 %v1291_v0, %s2366_s21 }
0x1c1d   :  { %v1294_v27 = vpop.permute.xlu1 %1293 }
0x1c1e   :  { %2170 = vmatmul.mubr.msk.bf16.vlgmr.msra.gmra.mrb[28].mxu1 %vm1152_vm8, %v1294_v27 }
0x1c1f   :  { %2180 = vmatpush3.bf16.msra.mxu1 %v2777_v7  ;;  %2181 = vmatprep.mubr.msk.bf16.mxu1 %vm2358_vm0, %v2357_v3 }
0x1c20   :  { %2191 = vmatprep.subr.bf16.mxu1 %v2357_v3 }
0x1cf1   :  { %v1332_v1 = vpop.f32.mrb[28].mxu1 }
0x1cf2   :  { %v1348_v2 = vadd.f32 %v1332_v1, %v2811_v29  ;;  %v2171_v5 = vpop.f32.mrb[29].mxu1  ;;  %v1339_v11 = vrot.slane %v1332_v1, 6 }
0x1cf3   :  { %v1335_v6 = vpop.f32.mrb[30].mxu1 }
0x1cf4   :  { %v1350_v8 = vrot.slane %v1348_v2, 6  ;;  %v2172_v10 = vpop.f32.mrb[31].mxu1  ;;  %v1341_v13 = vadd.f32 %v1339_v11, %v1290_v43 }
0x1cf6   :  { %1351 = vrot.lane.b32.xlu0 %v1350_v8, %s2364_s1  ;;  %v1976_v14 = vmul.f32 -1.442695, %v1341_v13 }
0x1cf8   :  { %2289 = vpow2.f32 %v1976_v14 }
0x1d02   :  { %v2290_v15 = vpop.eup %2289 }
0x1d03   :  { %v1345_v17 = vadd.f32 1.0, %v2290_v15 }
0x1d05   :  { %2291 = vrcp.f32 %v1345_v17 }
0x1d0f   :  { %v2292_v18 = vpop.eup %2291 }
0x1d10   :  { %v1361_v25 = vsub.f32 1.0, %v2292_v18  ;;  %v1370_v30 = vmul.f32 %v2292_v18, %v1368_v26 }
0x1d68   :  { %v1352_v19 = vpop.permute.xlu0 %1351 }
0x1d69   :  { %v1354_v20 = vmul.f32 %v2292_v18, %v1352_v19 }
0x1d6b   :  { %1356 = vrot.lane.b32.xlu1 %v1354_v20, %s2362_s3 }
0x1ddd   :  { %v1357_v22 = vpop.permute.xlu1 %1356 }
0x1dde   :  { %v1359_v23 = vadd.f32 %v1357_v22, %v1290_v43 }
0x1de0   :  { %2293 = vtanh.f32 %v1359_v23 }
0x1dea   :  { %v2294_v24 = vpop.eup %2293 }
0x1deb   :  { %1363 = vrot.lane.b32.xlu0 %v2294_v24, %s2366_s21 }
0x1e5d   :  { %v1364_v28 = vpop.permute.xlu0 %1363 }
0x1e5e   :  { %v1366_v31 = vmul.f32 %v1364_v28, %v1361_v25 }
0x1e60   :  { %v1371_v32 = vadd.f32 %v1370_v30, %v1366_v31 }
0x1e62   :  { %v1375_v33 = vpack.c.bf16 %v1371_v32, %v1371_v32  ;;  %v1453_v57 = vrot.slane %v1371_v32, 6  ;;  %v1787_v62 = vsel %vm1786_vm9, %v2827_v63, %v1371_v32 }
0x1e64   :  { %v1377_v16 = vrot.slane %v1375_v33, 1 }
0x1e66   :  { %1378 = vrot.lane.b32.xlu1 %v1377_v16, %s2366_s21 }
0x1ed8   :  { %v1379_v34 = vpop.permute.xlu1 %1378 }
0x1ed9   :  { %2176 = vmatmul.mubr.msk.bf16.vlgmr.msra.gmra.mrb[36].mxu0 %vm1152_vm8, %v1379_v34 }
0x1eda   :  { %2186 = vmatpush3.bf16.msra.mxu0 %v2777_v7  ;;  %2187 = vmatprep.mubr.msk.bf16.mxu0 %vm2358_vm0, %v2357_v3 }
0x1edb   :  { %2197 = vmatprep.subr.bf16.mxu0 %v2357_v3 }
0x1fac   :  { %v1417_v35 = vpop.f32.mrb[36].mxu0 }
0x1fad   :  { %v1433_v4 = vadd.f32 %v1417_v35, %v2811_v29  ;;  %v2177_v36 = vpop.f32.mrb[37].mxu0  ;;  %v1424_v39 = vrot.slane %v1417_v35, 4 }
0x1fae   :  { %v1420_v37 = vpop.f32.mrb[38].mxu0 }
0x1faf   :  { %v1435_v21 = vrot.slane %v1433_v4, 4  ;;  %v2178_v12 = vpop.f32.mrb[39].mxu0  ;;  %v1426_v41 = vadd.f32 %v1424_v39, %v2817_v44 }
0x1fb1   :  { %1436 = vrot.lane.b32.xlu0 %v1435_v21, %s2364_s1  ;;  %v1978_v43 = vmul.f32 -1.442695, %v1426_v41 }
0x1fb3   :  { %2295 = vpow2.f32 %v1978_v43 }
0x1fbd   :  { %v2296_v48 = vpop.eup %2295 }
0x1fbe   :  { %v1430_v49 = vadd.f32 1.0, %v2296_v48 }
0x1fc0   :  { %2297 = vrcp.f32 %v1430_v49 }
0x1fca   :  { %v2298_v50 = vpop.eup %2297 }
0x1fcb   :  { %v1446_v56 = vsub.f32 1.0, %v2298_v50  ;;  %v1455_v59 = vmul.f32 %v2298_v50, %v1453_v57 }
0x2023   :  { %v1437_v51 = vpop.permute.xlu0 %1436 }
0x2024   :  { %v1439_v52 = vmul.f32 %v2298_v50, %v1437_v51 }
0x2026   :  { %1441 = vrot.lane.b32.xlu1 %v1439_v52, %s2362_s3 }
0x2098   :  { %v1442_v53 = vpop.permute.xlu1 %1441 }
0x2099   :  { %v1444_v54 = vadd.f32 %v1442_v53, %v2817_v44 }
0x209b   :  { %2299 = vtanh.f32 %v1444_v54 }
0x20a5   :  { %v2300_v55 = vpop.eup %2299 }
0x20a6   :  { %1448 = vrot.lane.b32.xlu0 %v2300_v55, %s2366_s21 }
0x2118   :  { %v1449_v58 = vpop.permute.xlu0 %1448 }
0x2119   :  { %v1451_v60 = vmul.f32 %v1449_v58, %v1446_v56 }
0x211b   :  { %v1456_v61 = vadd.f32 %v1455_v59, %v1451_v60 }
0x211d   :  { %v1788_v0 = vsel %vm1030_vm4, %v1787_v62, %v1456_v61  ;;  %v1460_v27 = vpack.c.bf16 %v1456_v61, %v1456_v61  ;;  %v1538_v26 = vrot.slane %v1456_v61, 6 }
0x211f   :  { %v1462_v1 = vrot.slane %v1460_v27, 2 }
0x2121   :  { %1463 = vrot.lane.b32.xlu1 %v1462_v1, %s2366_s21 }
0x2193   :  { %v1464_v44 = vpop.permute.xlu1 %1463 }
0x2194   :  { %2182 = vmatmul.mubr.msk.bf16.vlgmr.msra.gmra.mrb[32].mxu1 %vm1152_vm8, %v1464_v44 }
0x2195   :  { %2192 = vmatpush3.bf16.msra.mxu1 %v2777_v7  ;;  %2193 = vmatprep.mubr.msk.bf16.mxu1 %vm2358_vm0, %v2357_v3 }
0x2196   :  { %2203 = vmatprep.subr.bf16.mxu1 %v2357_v3 }
0x2267   :  { %v1502_v2 = vpop.f32.mrb[32].mxu1 }
0x2268   :  { %v1518_v5 = vadd.f32 %v1502_v2, %v2811_v29  ;;  %v2183_v63 = vpop.f32.mrb[33].mxu1  ;;  %v1509_v11 = vrot.slane %v1502_v2, 2 }
0x2269   :  { %v1505_v6 = vpop.f32.mrb[34].mxu1 }
0x226a   :  { %v1520_v8 = vrot.slane %v1518_v5, 2  ;;  %v2184_v10 = vpop.f32.mrb[35].mxu1  ;;  %v1511_v13 = vadd.f32 %v1509_v11, %v2819_v45 }
0x226c   :  { %1521 = vrot.lane.b32.xlu0 %v1520_v8, %s2364_s1  ;;  %v1980_v14 = vmul.f32 -1.442695, %v1511_v13 }
0x226e   :  { %2301 = vpow2.f32 %v1980_v14 }
0x2278   :  { %v2302_v15 = vpop.eup %2301 }
0x2279   :  { %v1515_v17 = vadd.f32 1.0, %v2302_v15 }
0x227b   :  { %2303 = vrcp.f32 %v1515_v17 }
0x2285   :  { %v2304_v18 = vpop.eup %2303 }
0x2286   :  { %v1531_v25 = vsub.f32 1.0, %v2304_v18  ;;  %v1540_v30 = vmul.f32 %v2304_v18, %v1538_v26 }
0x22de   :  { %v1522_v19 = vpop.permute.xlu0 %1521 }
0x22df   :  { %v1524_v20 = vmul.f32 %v2304_v18, %v1522_v19 }
0x22e1   :  { %1526 = vrot.lane.b32.xlu1 %v1524_v20, %s2362_s3 }
0x2353   :  { %v1527_v22 = vpop.permute.xlu1 %1526 }
0x2354   :  { %v1529_v23 = vadd.f32 %v1527_v22, %v2819_v45 }
0x2356   :  { %2305 = vtanh.f32 %v1529_v23 }
0x2360   :  { %v2306_v24 = vpop.eup %2305 }
0x2361   :  { %1533 = vrot.lane.b32.xlu0 %v2306_v24, %s2366_s21 }
0x23d3   :  { %v1534_v28 = vpop.permute.xlu0 %1533 }
0x23d4   :  { %v1536_v31 = vmul.f32 %v1534_v28, %v1531_v25 }
0x23d6   :  { %v1541_v32 = vadd.f32 %v1540_v30, %v1536_v31 }
0x23d8   :  { %v1543_v33 = vpack.c.bf16 %v1541_v32, %v1541_v32  ;;  %v2870_v16 = vsel %vm1156_vm7, %v1788_v0, %v1541_v32  ;;  %v1617_v54 = vrot.slane %v1541_v32, 6 }
0x23da   :  { %v1545_v34 = vrot.slane %v1543_v33, 3 }
0x23dc   :  { %1546 = vrot.lane.b32.xlu1 %v1545_v34, %s2366_s21 }
0x244e   :  { %v1547_v35 = vpop.permute.xlu1 %1546 }
0x244f   :  { %2188 = vmatmul.mubr.msk.bf16.vlgmr.msra.gmra.mrb[40].mxu0 %vm1152_vm8, %v1547_v35 }
0x2450   :  { %2198 = vmatpush3.bf16.msra.mxu0 %v2777_v7  ;;  %2199 = vmatprep.mubr.msk.bf16.mxu0 %vm2358_vm0, %v2357_v3 }
0x2522   :  { %v1585_v45 = vpop.f32.mrb[40].mxu0 }
0x2523   :  { %v1598_v4 = vadd.f32 %v1585_v45, %v2811_v29  ;;  %v2189_v36 = vpop.f32.mrb[41].mxu0  ;;  %v1591_v12 = vadd.f32 %v1585_v45, %v2815_v42 }
0x2524   :  { %v1588_v37 = vpop.f32.mrb[42].mxu0 }
0x2525   :  { %1600 = vrot.lane.b32.xlu0 %v1598_v4, %s2364_s1  ;;  %v2190_v21 = vpop.f32.mrb[43].mxu0  ;;  %v1982_v39 = vmul.f32 -1.442695, %v1591_v12 }
0x2527   :  { %2307 = vpow2.f32 %v1982_v39  ;;  %v1792_v39 = vld [vmem:[%s2978_s17] sm:$0xff] }
0x2531   :  { %v2308_v41 = vpop.eup %2307 }
0x2532   :  { %v1595_v43 = vadd.f32 1.0, %v2308_v41  ;;  %v1793_v41 = vld [vmem:[%s2978_s17 + $0x8] sm:$0xf] }
0x2534   :  { %2309 = vrcp.f32 %v1595_v43  ;;  %v1795_v43 = vpack.c.bf16 %v1793_v41, %v1792_v39 }
0x253e   :  { %v2310_v48 = vpop.eup %2309 }
0x253f   :  { %v1610_v53 = vsub.f32 1.0, %v2310_v48  ;;  %v1619_v56 = vmul.f32 %v2310_v48, %v1617_v54 }
0x2597   :  { %v1601_v7 = vpop.permute.xlu0 %1600 }
0x2598   :  { %v1603_v49 = vmul.f32 %v2310_v48, %v1601_v7  ;;  %v1810_v48 = vsel %vm1156_vm7, %v1795_v43, 0 }
0x259a   :  { %1605 = vrot.lane.b32.xlu1 %v1603_v49, %s2362_s3 }
0x260c   :  { %v1606_v50 = vpop.permute.xlu1 %1605 }
0x260d   :  { %v1608_v51 = vadd.f32 %v1606_v50, %v2815_v42 }
0x260f   :  { %2311 = vtanh.f32 %v1608_v51 }
0x2619   :  { %v2312_v52 = vpop.eup %2311 }
0x261a   :  { %1612 = vrot.lane.b32.xlu0 %v2312_v52, %s2366_s21 }
0x268c   :  { %v1613_v55 = vpop.permute.xlu0 %1612 }
0x268d   :  { %v1615_v57 = vmul.f32 %v1613_v55, %v1610_v53 }
0x268f   :  { %v2883_v58 = vadd.f32 %v1619_v56, %v1615_v57 }
0x2691   :  { %v1622_v59 = vpack.c.bf16 %v2883_v58, %v2883_v58  ;;  %v1699_v17 = vrot.slane %v2883_v58, 6 }
0x2693   :  { %1624 = vrot.lane.b32.xlu1 %v1622_v59, %s2366_s21  ;;  %v1987_v59 = vld [vmem:[%s2979_s18] ss:$0 sm:$0xff] }
0x2705   :  { %v1625_v60 = vpop.permute.xlu1 %1624 }
0x2706   :  { %2194 = vmatmul.mubr.msk.bf16.vlgmr.msra.gmra.mrb[36].mxu1 %vm1152_vm8, %v1625_v60 }
0x2707   :  { %2205 = vmatprep.mubr.msk.bf16.mxu1 %vm2358_vm0, %v2357_v3  ;;  %2204 = vmatpush3.bf16.msra.mxu1 %v1810_v48 }
0x27d9   :  { %v1663_v42 = vpop.f32.mrb[36].mxu1 }
0x27da   :  { %v1679_v61 = vadd.f32 %v1663_v42, %v2811_v29  ;;  %v2195_v62 = vpop.f32.mrb[37].mxu1  ;;  %v1670_v44 = vrot.slane %v1663_v42, 6 }
0x27db   :  { %v1666_v0 = vpop.f32.mrb[38].mxu1 }
0x27dc   :  { %v1681_v27 = vrot.slane %v1679_v61, 6  ;;  %v2196_v1 = vpop.f32.mrb[39].mxu1  ;;  %v1672_v2 = vadd.f32 %v1670_v44, %v2821_v46  ;;  %v1880_v44 = vld [vmem:[%s3012_s5] sm:$0xff] }
0x27dd   :  { %v1881_v1 = vld [vmem:[%s3012_s5 + $0x8] sm:$0x3f] }
0x27de   :  { %1682 = vrot.lane.b32.xlu0 %v1681_v27, %s2364_s1  ;;  %v1984_v5 = vmul.f32 -1.442695, %v1672_v2 }
0x27e0   :  { %2313 = vpow2.f32 %v1984_v5 }
0x27ea   :  { %v2314_v63 = vpop.eup %2313 }
0x27eb   :  { %v1676_v6 = vadd.f32 1.0, %v2314_v63 }
0x27ed   :  { %2315 = vrcp.f32 %v1676_v6 }
0x27f7   :  { %v2316_v8 = vpop.eup %2315 }
0x27f8   :  { %v1692_v15 = vsub.f32 1.0, %v2316_v8  ;;  %v1701_v19 = vmul.f32 %v2316_v8, %v1699_v17 }
0x2850   :  { %v1683_v10 = vpop.permute.xlu0 %1682 }
0x2851   :  { %v1685_v3 = vmul.f32 %v2316_v8, %v1683_v10 }
0x2853   :  { %1687 = vrot.lane.b32.xlu1 %v1685_v3, %s2362_s3  ;;  %v1878_v3 = vlaneseq }
0x28c5   :  { %v1688_v11 = vpop.permute.xlu1 %1687 }
0x28c6   :  { %v1690_v13 = vadd.f32 %v1688_v11, %v2821_v46 }
0x28c8   :  { %2317 = vtanh.f32 %v1690_v13  ;;  %v1879_v13 = vand.u32 127, %v1878_v3 }
0x28d2   :  { %v2318_v14 = vpop.eup %2317 }
0x28d3   :  { %1694 = vrot.lane.b32.xlu0 %v2318_v14, %s2366_s21 }
0x2945   :  { %v1695_v18 = vpop.permute.xlu0 %1694 }
0x2946   :  { %v1697_v20 = vmul.f32 %v1695_v18, %v1692_v15 }
0x2948   :  { %v1702_v22 = vadd.f32 %v1701_v19, %v1697_v20 }
0x294a   :  { %v1704_v23 = vpack.c.bf16 %v1702_v22, %v1702_v22  ;;  %v1782_v50 = vrot.slane %v1702_v22, 6  ;;  %v1790_v54 = vsel %vm1786_vm9, %v2883_v58, %v1702_v22 }
0x294c   :  { %v1706_v24 = vrot.slane %v1704_v23, 1 }
0x294e   :  { %1707 = vrot.lane.b32.xlu1 %v1706_v24, %s2366_s21 }
0x29c0   :  { %v1708_v25 = vpop.permute.xlu1 %1707 }
0x29c1   :  { %2200 = vmatmul.mubr.msk.bf16.vlgmr.msra.gmra.mrb[44].mxu0 %vm1152_vm8, %v1708_v25  ;;  %v920_v25 = vmul.f32 0.5, %v919_v40 }
0x2a94   :  { %v1746_v26 = vpop.f32.mrb[44].mxu0 }
0x2a95   :  { %v1762_v46 = vadd.f32 %v1746_v26, %v2811_v29  ;;  %v2201_v28 = vpop.f32.mrb[45].mxu0  ;;  %v1753_v33 = vrot.slane %v1746_v26, 4  ;;  %v922_v26 = vsel %vm921_vm13, %v920_v25, 0.0 }
0x2a96   :  { %v1749_v30 = vpop.f32.mrb[46].mxu0 }
0x2a97   :  { %v1764_v31 = vrot.slane %v1762_v46, 4  ;;  %v2202_v32 = vpop.f32.mrb[47].mxu0  ;;  %v1755_v34 = vadd.f32 %v1753_v33, %v2823_v47 }
0x2a99   :  { %1765 = vrot.lane.b32.xlu0 %v1764_v31, %s2364_s1  ;;  %v1986_v35 = vmul.f32 -1.442695, %v1755_v34 }
0x2a9b   :  { %2319 = vpow2.f32 %v1986_v35 }
0x2aa5   :  { %v2320_v45 = vpop.eup %2319 }
0x2aa6   :  { %v1759_v4 = vadd.f32 1.0, %v2320_v45 }
0x2aa8   :  { %2321 = vrcp.f32 %v1759_v4 }
0x2ab2   :  { %v2322_v36 = vpop.eup %2321 }
0x2ab3   :  { %v1775_v49 = vsub.f32 1.0, %v2322_v36 }
0x2b0b   :  { %v1766_v37 = vpop.permute.xlu0 %1765 }
0x2b0c   :  { %v1768_v21 = vmul.f32 %v2322_v36, %v1766_v37 }
0x2b0e   :  { %1770 = vrot.lane.b32.xlu1 %v1768_v21, %s2362_s3 }
0x2b80   :  { %v1771_v29 = vpop.permute.xlu1 %1770 }
0x2b81   :  { %v1773_v12 = vadd.f32 %v1771_v29, %v2823_v47  ;;  %v1784_v47 = vmul.f32 %v2322_v36, %v1782_v50 }
0x2b83   :  { %2323 = vtanh.f32 %v1773_v12 }
0x2b8d   :  { %v2324_v7 = vpop.eup %2323 }
0x2b8e   :  { %1777 = vrot.lane.b32.xlu0 %v2324_v7, %s2366_s21 }
0x2c00   :  { %v1778_v51 = vpop.permute.xlu0 %1777 }
0x2c01   :  { %v1780_v52 = vmul.f32 %v1778_v51, %v1775_v49 }
0x2c03   :  { %v1785_v53 = vadd.f32 %v1784_v47, %v1780_v52 }
0x2c05   :  { %v1791_v55 = vsel %vm1030_vm4, %v1790_v54, %v1785_v53 }
0x2c06   :  { %v1794_v56 = vpack.c.bf16 %v1791_v55, %v2870_v16 }
0x2c08   :  { %1804 = vrot.lane.b32.xlu1 %v1794_v56, %s2366_s21 }
0x2c7a   :  { %v1805_v57 = vpop.permute.xlu1 %1804 }
0x2c7b   :  { %2206 = vmatmul.mubr.msk.bf16.vlgmr.msra.gmra.mrb[40].mxu1 %vm1152_vm8, %v1805_v57 }
0x2d4e   :  { %v1846_v60 = vpop.f32.mrb[40].mxu1 }
0x2d4f   :  { %v1847_v42 = vadd.f32 %v1987_v59, %v1846_v60  ;;  %v2207_v61 = vpop.f32.mrb[41].mxu1 }
0x2d50   :  { %v1849_v62 = vpop.f32.mrb[42].mxu1 }
0x2d51   :  { %v1850_v0 = vadd.f32 %v1987_v59, %v1849_v62  ;;  %v2208_v58 = vpop.f32.mrb[43].mxu1  ;;  %v1853_v27 = vsel %vm147_vm2, %v1847_v42, -inf }
0x2d52   :  { %1854 = vmax.xlane.f32.xlu0 %v1853_v27 }
0x2d53   :  { %v1857_v16 = vsel %vm1856_vm10, %v1850_v0, -inf }
0x2d54   :  { %1858 = vmax.xlane.f32.xlu1 %v1857_v16 }
0x2d65   :  { %1886 = vperm.xlu1 %2226, %v1881_v1  }
0x2d68   :  { %1883 = vperm.xlu0 %2225, %v1880_v44  }
0x2ddf   :  { %v1855_v2 = vpop.xlane.xlu0 %1854 }
0x2de0   :  { %v1860_v5 = vsub.f32 %v1847_v42, %v1855_v2 }
0x2de1   :  { %v1859_v63 = vpop.xlane.xlu1 %1858 }
0x2de2   :  { %v1862_v6 = vmul.f32 1.442695, %v1860_v5  ;;  %v1861_v8 = vsub.f32 %v1850_v0, %v1859_v63 }
0x2de4   :  { %2325 = vpow2.f32 %v1862_v6  ;;  %v1864_v10 = vmul.f32 1.442695, %v1861_v8 }
0x2de5   :  { %v1887_v15 = vpop.permute.xlu1 %1886 }
0x2de6   :  { %2327 = vpow2.f32 %v1864_v10  ;;  %vm1889_vm12 = vcmp.eq.s32.totalorder %v1879_v13, %v1887_v15 }
0x2de7   :  { %v1884_v11 = vpop.permute.xlu0 %1883  ;;  %v1891_v23 = vsel %vm1889_vm12, %v1850_v0, 0.0 }
0x2de8   :  { %vm1888_vm11 = vcmp.eq.s32.totalorder %v1879_v13, %v1884_v11  ;;  %v1895_v24 = vsel %vm1856_vm10, %v1891_v23, 0.0 }
0x2de9   :  { %v1890_v19 = vsel %vm1888_vm11, %v1847_v42, 0.0 }
0x2dea   :  { %v1892_v22 = vsel %vm147_vm2, %v1890_v19, 0.0 }
0x2dee   :  { %v2326_v14 = vpop.eup %2325 }
0x2def   :  { %v1866_v17 = vsel %vm147_vm2, %v2326_v14, 0.0 }
0x2df0   :  { %v2328_v18 = vpop.eup %2327  ;;  %1867 = vadd.xlane.f32.xlu1 %v1866_v17 }
0x2df1   :  { %v1869_v20 = vsel %vm1856_vm10, %v2328_v18, 0.0 }
0x2df2   :  { %1870 = vadd.xlane.f32.xlu0 %v1869_v20 }
0x2df4   :  { %1893 = vadd.xlane.f32.xlu1 %v1892_v22 }
0x2df8   :  { %1896 = vadd.xlane.f32.xlu1 %v1895_v24 }
0x2dfc   :  { %923 = vadd.xlane.f32.xlu1 %v922_v26 }
0x2e7d   :  { %v1868_v46 = vpop.xlane.xlu1 %1867 }
0x2e7e   :  { %2329 = vlog2.f32 %v1868_v46 }
0x2e7f   :  { %v1871_v28 = vpop.xlane.xlu0 %1870 }
0x2e80   :  { %2331 = vlog2.f32 %v1871_v28 }
0x2e81   :  { %v1894_v30 = vpop.xlane.xlu1 %1893 }
0x2e85   :  { %v1897_v31 = vpop.xlane.xlu1 %1896 }
0x2e88   :  { %v2330_v32 = vpop.eup %2329 }
0x2e89   :  { %v1873_v33 = vmul.f32 0.6931472, %v2330_v32  ;;  %v924_v34 = vpop.xlane.xlu1 %923 }
0x2e8a   :  { %v2332_v35 = vpop.eup %2331  ;;  %v925_v45 = vrot.slane %v924_v34, 4 }
0x2e8b   :  { %v1875_v4 = vmul.f32 0.6931472, %v2332_v35  ;;  %v1876_v36 = vadd.f32 %v1873_v33, %v1855_v2 }
0x2e8c   :  { %v926_v37 = vadd.f32 %v925_v45, %v924_v34 }
0x2e8d   :  { %v1898_v9 = vsub.f32 %v1876_v36, %v1894_v30  ;;  %v1877_v38 = vadd.f32 %v1875_v4, %v1859_v63 }
0x2e8e   :  { %v927_v40 = vrot.slane %v926_v37, 2 }
0x2e8f   :  { %v1899_v21 = vsub.f32 %v1877_v38, %v1897_v31  ;;  %v1901_v12 = vsel %vm1900_vm14, %v1898_v9, 0.0 }
0x2e90   :  { %v928_v29 = vadd.f32 %v927_v40, %v926_v37 }
0x2e91   :  { %v1903_v39 = vsel %vm1902_vm15, %v1899_v21, 0.0 }
0x2e92   :  { %v1904_v41 = vadd.f32 %v1903_v39, %v1901_v12  ;;  %v929_v43 = vrot.slane %v928_v29, 1 }
0x2e94   :  { %1905 = vadd.xlane.f32.xlu1 %v1904_v41  ;;  %v930_v48 = vadd.f32 %v929_v43, %v928_v29 }
0x2e96   :  { %2209 = vpush %v930_v48 }
0x2ec7   :  { %s2210_s20 = spop %2209 }
0x2ec8   :  { %s932_s10 = smul.f32 0.5, %s2210_s20 }
0x2eca   :  { %934 = sst [smem:[#allocation2]] %s932_s10 }
0x2ecb   :  { %2342 = shalt.err (!%p2339_p2)
}
0x2ecc   :  { %s2367_s11 = smov [#allocation2]   ;;  %s2343_s15 = scalar_lea.hbm %s2986_s25, 16 }
0x2ecd   :  { %1924 = dma.smem_to_hbm %s2367_s11, 16, %s2985_s24, [#allocation3]  }
0x2ece   :  { %p2344_p3 = scmp.ne.s32.totalorder %s2986_s25, %s2343_s15  ;;  %p2347_p4 = scmp.lt.u32.totalorder %s2343_s15, %s2986_s25 }
0x2ed0   :  { %p2349_p5 = pnand %p2347_p4, %p2344_p3 }
0x2f21   :  { %v1906_v7 = vpop.xlane.xlu1 %1905 }
0x2f22   :  { %v1907_v49 = vrot.slane %v1906_v7, 4 }
0x2f24   :  { %v1908_v50 = vadd.f32 %v1907_v49, %v1906_v7 }
0x2f26   :  { %v1909_v51 = vrot.slane %v1908_v50, 2 }
0x2f28   :  { %v1910_v47 = vadd.f32 %v1909_v51, %v1908_v50 }
0x2f2a   :  { %v1911_v52 = vrot.slane %v1910_v47, 1 }
0x2f2c   :  { %v1912_v53 = vadd.f32 %v1911_v52, %v1910_v47 }
0x2f2e   :  { %2211 = vpush %v1912_v53 }
0x2f5f   :  { %s2212_s26 = spop %2211 }
0x2f60   :  { %s1914_s13 = smul.f32 0.071428575, %s2212_s26 }
0x2f62   :  { %1916 = sst [smem:[#allocation4]] %s1914_s13 }
0x2f63   :  { %2352 = shalt.err (!%p2349_p5)
}
0x2f64   :  { %s2368_s8 = smov [#allocation4]  }
0x2f65   :  { %1932 = dma.smem_to_hbm %s2368_s8, 16, %s2986_s25, [#allocation5]  }
0x2f66   :  { %2353 = dma.done.wait [#allocation3], 16  }
0x2f67   :  { %2354 = vsyncadd [#allocation3], 4294967280 }
0x2f68   :  { %2355 = dma.done.wait [#allocation5], 16  }
0x2f69   :  { %2356 = vsyncadd [#allocation5], 4294967280 }
0x2f6a   :  { %1939 = sfence }
0x2f6b   :  { %1940 = vsyncpa [#allocation3], 1 }
0x2f6c   :  { %1941 = vsyncpa [#allocation5], 1 }

</bundles_post_ra>
